<compile_context>
chip_gen: v6e
topology: v6e:2x2x1
jax: 0.10.0
libtpu: 0.0.40
codegen_flags: <defaults>
</compile_context>

<pallas_src>
import functools

import numpy as np
import jax
import jax.numpy as jnp
from jax.experimental import pallas as pl
from jax.experimental.pallas import tpu as pltpu

BN_EPS = 1e-5
_BF16 = jnp.bfloat16
_F32 = jnp.float32


def _erf(z):
    # Abramowitz & Stegun 7.1.26 (max abs err ~1.5e-7) — exact-GELU erf built from exp/mul/add
    # (no native erf on the TPU vector units).  Exact division: the approx EUP reciprocal here
    # contributed to the previous tolerance failure.
    a1, a2, a3, a4, a5 = 0.254829592, -0.284496736, 1.421413741, -1.453152027, 1.061405429
    pc = 0.3275911
    sgn = jnp.where(z >= 0.0, 1.0, -1.0)
    za = jnp.abs(z)
    t = 1.0 / (1.0 + pc * za)
    poly = ((((a5 * t + a4) * t + a3) * t + a2) * t + a1) * t
    return sgn * (1.0 - poly * jnp.exp(-za * za))


def _gelu_exact(x):
    return 0.5 * x * (1.0 + _erf(x * (2.0 ** -0.5)))


def _batchnorm(z, gamma, beta):
    # Training-mode BatchNorm1d over all rows, biased variance, single pass: the centred value
    # `c` is computed once and reused (feedback: halve the reduction/subtract work, and this is
    # the structure the future tiled two-pass BN needs anyway).
    m = jnp.mean(z, axis=0, keepdims=True)
    c = z - m
    var = jnp.mean(c * c, axis=0, keepdims=True)
    return c * jax.lax.rsqrt(var + BN_EPS) * gamma + beta


def make_kernel(bs, L, d_model, n_heads):
    d_k = d_model // n_heads
    R = bs * L

    def kernel(x_ref, wqkv_ref, bqkv_ref, wo_ref, bo_ref,
               g1_ref, be1_ref, g2_ref, be2_ref,
               w1_ref, bf1_ref, w2_ref, bf2_ref, out_ref):
        x = x_ref[...]                                                     # (R, D) f32

        # ---- fused QKV projection: one (R,D)@(D,3D) GEMM, bf16 operands, f32 MXU accumulation.
        #      The 1/sqrt(d_k) attention scale is pre-folded into the Q columns of wqkv/bqkv.
        qkv = jnp.dot(x.astype(_BF16), wqkv_ref[...],
                      preferred_element_type=_F32) + bqkv_ref[...]
        qkv = qkv.astype(_BF16)

        # ---- head-batched multi-head attention --------------------------------------------
        # Regroup q/k/v once to a merged (n_heads*bs) leading batch axis so the whole attention
        # stage is two single-batch-dim rank-3 dot_generals (Mosaic-friendly) instead of a
        # per-head Python loop of 8 tiny matmuls.
        def split_heads(off):
            return jnp.concatenate(
                [qkv[:, off + h * d_k: off + (h + 1) * d_k].reshape(bs, L, d_k)
                 for h in range(n_heads)], axis=0)                         # (H*bs, L, d_k)

        q = split_heads(0)
        k = split_heads(d_model)
        v = split_heads(2 * d_model)

        s = jnp.einsum('bqd,bkd->bqk', q, k, preferred_element_type=_F32)  # (H*bs, L, L)
        s = s - jnp.max(s, axis=-1, keepdims=True)
        p = jnp.exp(s)
        p = p / jnp.sum(p, axis=-1, keepdims=True)                         # exact normalisation
        o = jnp.einsum('bqk,bkd->bqd', p.astype(_BF16), v,
                       preferred_element_type=_F32).astype(_BF16)          # (H*bs, L, d_k)

        # ---- output projection: re-assemble the per-head context and run ONE K=d_model GEMM
        #      (replaces 4 serialized K=d_k accumulating GEMMs).
        ctx = jnp.concatenate(
            [o[h * bs:(h + 1) * bs].reshape(R, d_k) for h in range(n_heads)], axis=-1)
        x1 = x + jnp.dot(ctx, wo_ref[...], preferred_element_type=_F32) + bo_ref[...]

        # ---- BatchNorm -> position-wise FFN (Linear, exact GELU, Linear) -> residual -> BN ----
        xn = _batchnorm(x1, g1_ref[...], be1_ref[...])
        h1 = jnp.dot(xn.astype(_BF16), w1_ref[...], preferred_element_type=_F32) + bf1_ref[...]
        h1 = _gelu_exact(h1)
        ff = jnp.dot(h1.astype(_BF16), w2_ref[...], preferred_element_type=_F32) + bf2_ref[...]
        out_ref[...] = _batchnorm(xn + ff, g2_ref[...], be2_ref[...])

    return kernel


def prepare_params(params, n_heads):
    """One-time parameter fusion, OUTSIDE the per-call jit path:
    concatenate W_Q|W_K|W_V into one (d_model, 3*d_model) bf16 matrix, fold the 1/sqrt(d_k)
    attention scale into the Q columns/bias, and cast all matmul weights to bf16."""
    d_model = params["wq"].shape[0]
    d_k = d_model // n_heads
    scale = float(d_k) ** -0.5
    wqkv = jnp.concatenate([params["wq"] * scale, params["wk"], params["wv"]], axis=1)
    bqkv = jnp.concatenate([params["bq"] * scale, params["bk"], params["bv"]], axis=1)
    return dict(
        wqkv=wqkv.astype(_BF16), bqkv=bqkv.astype(_F32),
        wo=params["wo"].astype(_BF16), bo=params["bo"],
        g1=params["g1"], be1=params["be1"], g2=params["g2"], be2=params["be2"],
        w1=params["w1"].astype(_BF16), bf1=params["bf1"],
        w2=params["w2"].astype(_BF16), bf2=params["bf2"],
    )


@functools.partial(jax.jit, static_argnums=(2,))
def tst_encoder_layer(src, prep, n_heads):
    bs, L, d_model = src.shape
    d_ff = prep["w1"].shape[1]
    R = bs * L

    # Wrapper-side reshape (free in XLA) keeps kernel I/O 2-D and the output store lane-dense
    # (d_model is a multiple of 128 here).
    x2d = src.reshape(R, d_model)

    args = (x2d, prep["wqkv"], prep["bqkv"], prep["wo"], prep["bo"],
            prep["g1"], prep["be1"], prep["g2"], prep["be2"],
            prep["w1"], prep["bf1"], prep["w2"], prep["bf2"])

    kernel = make_kernel(bs, L, d_model, n_heads)

    flops = (2 * R * d_model * 3 * d_model          # fused QKV
             + 4 * bs * L * L * d_model             # scores + context over all heads
             + 2 * R * d_model * d_model            # fused output projection
             + 4 * R * d_model * d_ff)              # FFN
    transcendentals = bs * n_heads * L * L + R * d_ff
    io_bytes = sum(int(np.prod(a.shape)) * a.dtype.itemsize for a in args) + R * d_model * 4
    # VMEM budget: generous multiple of the working set, capped at 40 MiB so it leaves headroom
    # inside v7x's 64 MiB physical VMEM as well as v5e/v6e's 128 MiB.
    vmem_limit = int(min(max(4 * 1024 * 1024, 8 * io_bytes), 40 * 1024 * 1024))

    vmem = pl.BlockSpec(memory_space=pltpu.MemorySpace.VMEM)
    out2d = pl.pallas_call(
        kernel,
        out_shape=jax.ShapeDtypeStruct((R, d_model), jnp.float32),
        in_specs=[vmem] * len(args),
        out_specs=vmem,
        input_output_aliases={0: 0},   # reuse the (R, d_model) f32 buffer for the output
        compiler_params=pltpu.CompilerParams(vmem_limit_bytes=vmem_limit),
        cost_estimate=pl.CostEstimate(flops=flops, transcendentals=transcendentals,
                                      bytes_accessed=io_bytes),
    )(*args)
    return out2d.reshape(bs, L, d_model)


def reference_mixed(src, prep, n_heads):
    """Precision-matched pure-JAX mirror of the kernel: same prepared (bf16, scale-folded)
    weights, same bf16-operand / f32-accumulation matmuls, same GELU polynomial and BN helper."""
    bs, L, D = src.shape
    d_k = D // n_heads
    R = bs * L
    x = src.reshape(R, D)
    qkv = (jnp.dot(x.astype(_BF16), prep["wqkv"], preferred_element_type=_F32)
           + prep["bqkv"]).astype(_BF16)
    q = qkv[:, :D].reshape(bs, L, n_heads, d_k).transpose(0, 2, 1, 3)
    k = qkv[:, D:2 * D].reshape(bs, L, n_heads, d_k).transpose(0, 2, 1, 3)
    v = qkv[:, 2 * D:].reshape(bs, L, n_heads, d_k).transpose(0, 2, 1, 3)
    s = jnp.einsum('bhqd,bhkd->bhqk', q, k, preferred_element_type=_F32)
    s = s - jnp.max(s, axis=-1, keepdims=True)
    p = jnp.exp(s)
    p = p / jnp.sum(p, axis=-1, keepdims=True)
    o = jnp.einsum('bhqk,bhkd->bhqd', p.astype(_BF16), v, preferred_element_type=_F32)
    ctx = o.astype(_BF16).transpose(0, 2, 1, 3).reshape(R, D)
    x1 = x + jnp.dot(ctx, prep["wo"], preferred_element_type=_F32) + prep["bo"]
    xn = _batchnorm(x1, prep["g1"], prep["be1"])
    h1 = _gelu_exact(jnp.dot(xn.astype(_BF16), prep["w1"], preferred_element_type=_F32)
                     + prep["bf1"])
    ff = jnp.dot(h1.astype(_BF16), prep["w2"], preferred_element_type=_F32) + prep["bf2"]
    return _batchnorm(xn + ff, prep["g2"], prep["be2"]).reshape(bs, L, D)


def reference_f32(src, params, n_heads):
    """Pure-f32 mirror of the PyTorch TSTEncoderLayer forward (exact erf GELU, exact softmax)."""
    bs, L, D = src.shape
    d_k = D // n_heads
    scale = float(d_k) ** -0.5
    x = src.reshape(bs * L, D)
    q = (x @ params["wq"] + params["bq"]).reshape(bs, L, n_heads, d_k).transpose(0, 2, 1, 3)
    k = (x @ params["wk"] + params["bk"]).reshape(bs, L, n_heads, d_k).transpose(0, 2, 1, 3)
    v = (x @ params["wv"] + params["bv"]).reshape(bs, L, n_heads, d_k).transpose(0, 2, 1, 3)
    s = jnp.einsum('bhqd,bhkd->bhqk', q, k) * scale
    p = jax.nn.softmax(s, axis=-1)
    o = jnp.einsum('bhqk,bhkd->bhqd', p, v)
    ctx = o.transpose(0, 2, 1, 3).reshape(bs * L, D)
    x1 = x + ctx @ params["wo"] + params["bo"]

    def bn(z, g, b):
        m = z.mean(0, keepdims=True)
        c = z - m
        return c / jnp.sqrt((c * c).mean(0, keepdims=True) + BN_EPS) * g + b

    xn = bn(x1, params["g1"], params["be1"])
    h = jax.nn.gelu(xn @ params["w1"] + params["bf1"], approximate=False)
    ff = h @ params["w2"] + params["bf2"]
    return bn(xn + ff, params["g2"], params["be2"]).reshape(bs, L, D)


def init_params(key, d_model, n_heads, d_ff):
    d_k = d_model // n_heads
    d_v = d_model // n_heads
    ks = jax.random.split(key, 12)
    f = jnp.float32

    def w(k, shape, s=0.1):
        return (s * jax.random.normal(k, shape)).astype(f)

    return dict(
        # Linear weights stored transposed vs. PyTorch: (in_features, out_features).
        wq=w(ks[0], (d_model, d_k * n_heads)), bq=w(ks[1], (1, d_k * n_heads), 0.02),
        wk=w(ks[2], (d_model, d_k * n_heads)), bk=w(ks[3], (1, d_k * n_heads), 0.02),
        wv=w(ks[4], (d_model, d_v * n_heads)), bv=w(ks[5], (1, d_v * n_heads), 0.02),
        wo=w(ks[6], (n_heads * d_v, d_model)), bo=w(ks[7], (1, d_model), 0.02),
        g1=jnp.ones((1, d_model), f), be1=jnp.zeros((1, d_model), f),
        g2=jnp.ones((1, d_model), f), be2=jnp.zeros((1, d_model), f),
        w1=w(ks[8], (d_model, d_ff)), bf1=w(ks[9], (1, d_ff), 0.02),
        w2=w(ks[10], (d_ff, d_model)), bf2=w(ks[11], (1, d_model), 0.02),
    )


if __name__ == "__main__":
    # Small but lane-friendly shapes: batch=2, q_len=16, d_model=128, n_heads=4, d_ff=256.
    bs, L, d_model, n_heads, d_ff = 2, 16, 128, 4, 256

    key = jax.random.PRNGKey(0)
    k_src, k_par = jax.random.split(key)
    src = jax.random.normal(k_src, (bs, L, d_model), dtype=jnp.float32)
    params = init_params(k_par, d_model, n_heads, d_ff)
    prep = prepare_params(params, n_heads)          # one-time weight fusion, outside jit

    out = jax.block_until_ready(tst_encoder_layer(src, prep, n_heads))

    # 1) Tight element-wise check against the precision-matched (same bf16 weights, same GELU/BN
    #    helpers) mirror of the kernel.
    ref_m = jax.block_until_ready(reference_mixed(src, prep, n_heads))
    np.testing.assert_allclose(np.asarray(out), np.asarray(ref_m), rtol=1e-2, atol=1e-2)

    # 2) Global relative-error check against the exact f32 PyTorch-mirror reference (bounded
    #    loosely because the kernel uses bf16 matmul operands with f32 accumulation).
    ref_f = jax.block_until_ready(reference_f32(src, params, n_heads))
    rel = (np.linalg.norm(np.asarray(out) - np.asarray(ref_f))
           / np.linalg.norm(np.asarray(ref_f)))
    assert rel < 3e-2, f"relative error vs f32 reference too large: {rel}"

    print("KERNEL_OK")
</pallas_src>

<mosaic_0001>
module attributes {stable_mosaic.version = 11 : i64} {
  func.func @kernel(%arg0: memref<32x128xf32, #tpu.memory_space<vmem>>, %arg1: memref<128x384xbf16, #tpu.memory_space<vmem>>, %arg2: memref<1x384xf32, #tpu.memory_space<vmem>>, %arg3: memref<128x128xbf16, #tpu.memory_space<vmem>>, %arg4: memref<1x128xf32, #tpu.memory_space<vmem>>, %arg5: memref<1x128xf32, #tpu.memory_space<vmem>>, %arg6: memref<1x128xf32, #tpu.memory_space<vmem>>, %arg7: memref<1x128xf32, #tpu.memory_space<vmem>>, %arg8: memref<1x128xf32, #tpu.memory_space<vmem>>, %arg9: memref<128x256xbf16, #tpu.memory_space<vmem>>, %arg10: memref<1x256xf32, #tpu.memory_space<vmem>>, %arg11: memref<256x128xbf16, #tpu.memory_space<vmem>>, %arg12: memref<1x128xf32, #tpu.memory_space<vmem>>, %arg13: memref<32x128xf32, #tpu.memory_space<vmem>>) attributes {dimension_semantics = [], scalar_prefetch = 0 : i64, scratch_operands = 0 : i64, tpu.core_type = #tpu.core_type<tc>} {
    %c0 = arith.constant 0 : index
    %c0_0 = arith.constant 0 : index
    %0 = vector.load %arg0[%c0, %c0_0] : memref<32x128xf32, #tpu.memory_space<vmem>>, vector<32x128xf32>
    %1 = arith.truncf %0 : vector<32x128xf32> to vector<32x128xbf16>
    %c0_1 = arith.constant 0 : index
    %c0_2 = arith.constant 0 : index
    %2 = vector.load %arg1[%c0_1, %c0_2] : memref<128x384xbf16, #tpu.memory_space<vmem>>, vector<128x384xbf16>
    %cst = arith.constant dense<0.000000e+00> : vector<32x384xf32>
    %3 = tpu.matmul %1, %2, %cst {dimension_numbers = #tpu.dot_dimension_numbers<[1], [0], [0], [1], [0, 0, 1, 1], [], []>} : vector<32x128xbf16>, vector<128x384xbf16>, vector<32x384xf32> -> vector<32x384xf32>
    %c0_3 = arith.constant 0 : index
    %c0_4 = arith.constant 0 : index
    %4 = vector.load %arg2[%c0_3, %c0_4] : memref<1x384xf32, #tpu.memory_space<vmem>>, vector<1x384xf32>
    %5 = vector.broadcast %4 : vector<1x384xf32> to vector<32x384xf32>
    %6 = arith.addf %3, %5 : vector<32x384xf32>
    %7 = arith.truncf %6 : vector<32x384xf32> to vector<32x384xbf16>
    %8 = vector.extract_strided_slice %7 {offsets = [0, 0], sizes = [32, 32], strides = [1, 1]} : vector<32x384xbf16> to vector<32x32xbf16>
    %9 = vector.shape_cast %8 : vector<32x32xbf16> to vector<2x16x32xbf16>
    %10 = vector.extract_strided_slice %7 {offsets = [0, 32], sizes = [32, 32], strides = [1, 1]} : vector<32x384xbf16> to vector<32x32xbf16>
    %11 = vector.shape_cast %10 : vector<32x32xbf16> to vector<2x16x32xbf16>
    %12 = vector.extract_strided_slice %7 {offsets = [0, 64], sizes = [32, 32], strides = [1, 1]} : vector<32x384xbf16> to vector<32x32xbf16>
    %13 = vector.shape_cast %12 : vector<32x32xbf16> to vector<2x16x32xbf16>
    %14 = vector.extract_strided_slice %7 {offsets = [0, 96], sizes = [32, 32], strides = [1, 1]} : vector<32x384xbf16> to vector<32x32xbf16>
    %15 = vector.shape_cast %14 : vector<32x32xbf16> to vector<2x16x32xbf16>
    %16 = tpu.concatenate %9, %11, %13, %15 in 0 : vector<2x16x32xbf16>, vector<2x16x32xbf16>, vector<2x16x32xbf16>, vector<2x16x32xbf16> -> vector<8x16x32xbf16>
    %17 = vector.extract_strided_slice %7 {offsets = [0, 128], sizes = [32, 32], strides = [1, 1]} : vector<32x384xbf16> to vector<32x32xbf16>
    %18 = vector.shape_cast %17 : vector<32x32xbf16> to vector<2x16x32xbf16>
    %19 = vector.extract_strided_slice %7 {offsets = [0, 160], sizes = [32, 32], strides = [1, 1]} : vector<32x384xbf16> to vector<32x32xbf16>
    %20 = vector.shape_cast %19 : vector<32x32xbf16> to vector<2x16x32xbf16>
    %21 = vector.extract_strided_slice %7 {offsets = [0, 192], sizes = [32, 32], strides = [1, 1]} : vector<32x384xbf16> to vector<32x32xbf16>
    %22 = vector.shape_cast %21 : vector<32x32xbf16> to vector<2x16x32xbf16>
    %23 = vector.extract_strided_slice %7 {offsets = [0, 224], sizes = [32, 32], strides = [1, 1]} : vector<32x384xbf16> to vector<32x32xbf16>
    %24 = vector.shape_cast %23 : vector<32x32xbf16> to vector<2x16x32xbf16>
    %25 = tpu.concatenate %18, %20, %22, %24 in 0 : vector<2x16x32xbf16>, vector<2x16x32xbf16>, vector<2x16x32xbf16>, vector<2x16x32xbf16> -> vector<8x16x32xbf16>
    %26 = vector.extract_strided_slice %7 {offsets = [0, 256], sizes = [32, 32], strides = [1, 1]} : vector<32x384xbf16> to vector<32x32xbf16>
    %27 = vector.shape_cast %26 : vector<32x32xbf16> to vector<2x16x32xbf16>
    %28 = vector.extract_strided_slice %7 {offsets = [0, 288], sizes = [32, 32], strides = [1, 1]} : vector<32x384xbf16> to vector<32x32xbf16>
    %29 = vector.shape_cast %28 : vector<32x32xbf16> to vector<2x16x32xbf16>
    %30 = vector.extract_strided_slice %7 {offsets = [0, 320], sizes = [32, 32], strides = [1, 1]} : vector<32x384xbf16> to vector<32x32xbf16>
    %31 = vector.shape_cast %30 : vector<32x32xbf16> to vector<2x16x32xbf16>
    %32 = vector.extract_strided_slice %7 {offsets = [0, 352], sizes = [32, 32], strides = [1, 1]} : vector<32x384xbf16> to vector<32x32xbf16>
    %33 = vector.shape_cast %32 : vector<32x32xbf16> to vector<2x16x32xbf16>
    %34 = tpu.concatenate %27, %29, %31, %33 in 0 : vector<2x16x32xbf16>, vector<2x16x32xbf16>, vector<2x16x32xbf16>, vector<2x16x32xbf16> -> vector<8x16x32xbf16>
    "tpu.trace_start"() <{level = 10 : i32, message = "bqd,bkd->bqk"}> : () -> ()
    %cst_5 = arith.constant dense<0.000000e+00> : vector<8x16x16xf32>
    %35 = tpu.matmul %16, %25, %cst_5 {dimension_numbers = #tpu.dot_dimension_numbers<[2], [2], [1], [1], [0, 0, 0, 1, 1, 1], [0], [0]>} : vector<8x16x32xbf16>, vector<8x16x32xbf16>, vector<8x16x16xf32> -> vector<8x16x16xf32>
    "tpu.trace_stop"() : () -> ()
    %cst_6 = arith.constant dense<0xFF800000> : vector<8x16xf32>
    %36 = vector.multi_reduction <maximumf>, %35, %cst_6 [2] : vector<8x16x16xf32> to vector<8x16xf32>
    %37 = vector.shape_cast %36 : vector<8x16xf32> to vector<8x16x1xf32>
    %38 = vector.broadcast %37 : vector<8x16x1xf32> to vector<8x16x16xf32>
    %39 = arith.subf %35, %38 : vector<8x16x16xf32>
    %40 = math.exp %39 : vector<8x16x16xf32>
    %cst_7 = arith.constant dense<0.000000e+00> : vector<8x16xf32>
    %41 = vector.multi_reduction <add>, %40, %cst_7 [2] : vector<8x16x16xf32> to vector<8x16xf32>
    %42 = vector.shape_cast %41 : vector<8x16xf32> to vector<8x16x1xf32>
    %43 = vector.broadcast %42 : vector<8x16x1xf32> to vector<8x16x16xf32>
    %44 = arith.divf %40, %43 : vector<8x16x16xf32>
    %45 = arith.truncf %44 : vector<8x16x16xf32> to vector<8x16x16xbf16>
    "tpu.trace_start"() <{level = 10 : i32, message = "bqk,bkd->bqd"}> : () -> ()
    %cst_8 = arith.constant dense<0.000000e+00> : vector<8x16x32xf32>
    %46 = tpu.matmul %45, %34, %cst_8 {dimension_numbers = #tpu.dot_dimension_numbers<[2], [1], [1], [2], [0, 0, 0, 1, 1, 2], [0], [0]>} : vector<8x16x16xbf16>, vector<8x16x32xbf16>, vector<8x16x32xf32> -> vector<8x16x32xf32>
    "tpu.trace_stop"() : () -> ()
    %47 = arith.truncf %46 : vector<8x16x32xf32> to vector<8x16x32xbf16>
    %48 = vector.extract_strided_slice %47 {offsets = [0, 0, 0], sizes = [2, 16, 32], strides = [1, 1, 1]} : vector<8x16x32xbf16> to vector<2x16x32xbf16>
    %49 = vector.shape_cast %48 : vector<2x16x32xbf16> to vector<32x32xbf16>
    %50 = vector.extract_strided_slice %47 {offsets = [2, 0, 0], sizes = [2, 16, 32], strides = [1, 1, 1]} : vector<8x16x32xbf16> to vector<2x16x32xbf16>
    %51 = vector.shape_cast %50 : vector<2x16x32xbf16> to vector<32x32xbf16>
    %52 = vector.extract_strided_slice %47 {offsets = [4, 0, 0], sizes = [2, 16, 32], strides = [1, 1, 1]} : vector<8x16x32xbf16> to vector<2x16x32xbf16>
    %53 = vector.shape_cast %52 : vector<2x16x32xbf16> to vector<32x32xbf16>
    %54 = vector.extract_strided_slice %47 {offsets = [6, 0, 0], sizes = [2, 16, 32], strides = [1, 1, 1]} : vector<8x16x32xbf16> to vector<2x16x32xbf16>
    %55 = vector.shape_cast %54 : vector<2x16x32xbf16> to vector<32x32xbf16>
    %56 = tpu.concatenate %49, %51, %53, %55 in 1 : vector<32x32xbf16>, vector<32x32xbf16>, vector<32x32xbf16>, vector<32x32xbf16> -> vector<32x128xbf16>
    %c0_9 = arith.constant 0 : index
    %c0_10 = arith.constant 0 : index
    %57 = vector.load %arg3[%c0_9, %c0_10] : memref<128x128xbf16, #tpu.memory_space<vmem>>, vector<128x128xbf16>
    %cst_11 = arith.constant dense<0.000000e+00> : vector<32x128xf32>
    %58 = tpu.matmul %56, %57, %cst_11 {dimension_numbers = #tpu.dot_dimension_numbers<[1], [0], [0], [1], [0, 0, 1, 1], [], []>} : vector<32x128xbf16>, vector<128x128xbf16>, vector<32x128xf32> -> vector<32x128xf32>
    %59 = arith.addf %0, %58 : vector<32x128xf32>
    %c0_12 = arith.constant 0 : index
    %c0_13 = arith.constant 0 : index
    %60 = vector.load %arg4[%c0_12, %c0_13] : memref<1x128xf32, #tpu.memory_space<vmem>>, vector<1x128xf32>
    %61 = vector.broadcast %60 : vector<1x128xf32> to vector<32x128xf32>
    %62 = arith.addf %59, %61 : vector<32x128xf32>
    %c0_14 = arith.constant 0 : index
    %c0_15 = arith.constant 0 : index
    %63 = vector.load %arg5[%c0_14, %c0_15] : memref<1x128xf32, #tpu.memory_space<vmem>>, vector<1x128xf32>
    %c0_16 = arith.constant 0 : index
    %c0_17 = arith.constant 0 : index
    %64 = vector.load %arg6[%c0_16, %c0_17] : memref<1x128xf32, #tpu.memory_space<vmem>>, vector<1x128xf32>
    %cst_18 = arith.constant dense<0.000000e+00> : vector<128xf32>
    %65 = vector.multi_reduction <add>, %62, %cst_18 [0] : vector<32x128xf32> to vector<128xf32>
    %66 = vector.shape_cast %65 : vector<128xf32> to vector<1x128xf32>
    %cst_19 = arith.constant 3.200000e+01 : f32
    %67 = vector.broadcast %cst_19 : f32 to vector<1x128xf32>
    %68 = arith.divf %66, %67 : vector<1x128xf32>
    %69 = vector.broadcast %68 : vector<1x128xf32> to vector<32x128xf32>
    %70 = arith.subf %62, %69 : vector<32x128xf32>
    %71 = arith.mulf %70, %70 : vector<32x128xf32>
    %cst_20 = arith.constant dense<0.000000e+00> : vector<128xf32>
    %72 = vector.multi_reduction <add>, %71, %cst_20 [0] : vector<32x128xf32> to vector<128xf32>
    %73 = vector.shape_cast %72 : vector<128xf32> to vector<1x128xf32>
    %cst_21 = arith.constant 3.200000e+01 : f32
    %74 = vector.broadcast %cst_21 : f32 to vector<1x128xf32>
    %75 = arith.divf %73, %74 : vector<1x128xf32>
    %cst_22 = arith.constant 9.99999974E-6 : f32
    %76 = vector.broadcast %cst_22 : f32 to vector<1x128xf32>
    %77 = arith.addf %75, %76 : vector<1x128xf32>
    %78 = math.rsqrt %77 : vector<1x128xf32>
    %79 = vector.broadcast %78 : vector<1x128xf32> to vector<32x128xf32>
    %80 = arith.mulf %70, %79 : vector<32x128xf32>
    %81 = vector.broadcast %63 : vector<1x128xf32> to vector<32x128xf32>
    %82 = arith.mulf %80, %81 : vector<32x128xf32>
    %83 = vector.broadcast %64 : vector<1x128xf32> to vector<32x128xf32>
    %84 = arith.addf %82, %83 : vector<32x128xf32>
    %85 = arith.truncf %84 : vector<32x128xf32> to vector<32x128xbf16>
    %c0_23 = arith.constant 0 : index
    %c0_24 = arith.constant 0 : index
    %86 = vector.load %arg9[%c0_23, %c0_24] : memref<128x256xbf16, #tpu.memory_space<vmem>>, vector<128x256xbf16>
    %cst_25 = arith.constant dense<0.000000e+00> : vector<32x256xf32>
    %87 = tpu.matmul %85, %86, %cst_25 {dimension_numbers = #tpu.dot_dimension_numbers<[1], [0], [0], [1], [0, 0, 1, 1], [], []>} : vector<32x128xbf16>, vector<128x256xbf16>, vector<32x256xf32> -> vector<32x256xf32>
    %c0_26 = arith.constant 0 : index
    %c0_27 = arith.constant 0 : index
    %88 = vector.load %arg10[%c0_26, %c0_27] : memref<1x256xf32, #tpu.memory_space<vmem>>, vector<1x256xf32>
    %89 = vector.broadcast %88 : vector<1x256xf32> to vector<32x256xf32>
    %90 = arith.addf %87, %89 : vector<32x256xf32>
    %cst_28 = arith.constant 5.000000e-01 : f32
    %91 = vector.broadcast %cst_28 : f32 to vector<32x256xf32>
    %92 = arith.mulf %91, %90 : vector<32x256xf32>
    %cst_29 = arith.constant 0.707106769 : f32
    %93 = vector.broadcast %cst_29 : f32 to vector<32x256xf32>
    %94 = arith.mulf %90, %93 : vector<32x256xf32>
    %cst_30 = arith.constant 0.000000e+00 : f32
    %95 = vector.broadcast %cst_30 : f32 to vector<32x256xf32>
    %96 = arith.cmpf oge, %94, %95 : vector<32x256xf32>
    %cst_31 = arith.constant 1.000000e+00 : f32
    %cst_32 = arith.constant -1.000000e+00 : f32
    %97 = vector.broadcast %cst_31 : f32 to vector<32x256xf32>
    %98 = vector.broadcast %cst_32 : f32 to vector<32x256xf32>
    %99 = arith.select %96, %97, %98 : vector<32x256xi1>, vector<32x256xf32>
    %100 = math.absf %94 : vector<32x256xf32>
    %cst_33 = arith.constant 0.327591091 : f32
    %101 = vector.broadcast %cst_33 : f32 to vector<32x256xf32>
    %102 = arith.mulf %101, %100 : vector<32x256xf32>
    %cst_34 = arith.constant 1.000000e+00 : f32
    %103 = vector.broadcast %cst_34 : f32 to vector<32x256xf32>
    %104 = arith.addf %103, %102 : vector<32x256xf32>
    %cst_35 = arith.constant 1.000000e+00 : f32
    %105 = vector.broadcast %cst_35 : f32 to vector<32x256xf32>
    %106 = arith.divf %105, %104 : vector<32x256xf32>
    %cst_36 = arith.constant 1.06140542 : f32
    %107 = vector.broadcast %cst_36 : f32 to vector<32x256xf32>
    %108 = arith.mulf %107, %106 : vector<32x256xf32>
    %cst_37 = arith.constant -1.45315206 : f32
    %109 = vector.broadcast %cst_37 : f32 to vector<32x256xf32>
    %110 = arith.addf %108, %109 : vector<32x256xf32>
    %111 = arith.mulf %110, %106 : vector<32x256xf32>
    %cst_38 = arith.constant 1.42141378 : f32
    %112 = vector.broadcast %cst_38 : f32 to vector<32x256xf32>
    %113 = arith.addf %111, %112 : vector<32x256xf32>
    %114 = arith.mulf %113, %106 : vector<32x256xf32>
    %cst_39 = arith.constant -0.284496725 : f32
    %115 = vector.broadcast %cst_39 : f32 to vector<32x256xf32>
    %116 = arith.addf %114, %115 : vector<32x256xf32>
    %117 = arith.mulf %116, %106 : vector<32x256xf32>
    %cst_40 = arith.constant 0.254829586 : f32
    %118 = vector.broadcast %cst_40 : f32 to vector<32x256xf32>
    %119 = arith.addf %117, %118 : vector<32x256xf32>
    %120 = arith.mulf %119, %106 : vector<32x256xf32>
    %cst_41 = arith.constant 0.000000e+00 : f32
    %121 = vector.broadcast %cst_41 : f32 to vector<32x256xf32>
    %122 = arith.subf %121, %100 : vector<32x256xf32>
    %123 = arith.mulf %122, %100 : vector<32x256xf32>
    %124 = math.exp %123 : vector<32x256xf32>
    %125 = arith.mulf %120, %124 : vector<32x256xf32>
    %cst_42 = arith.constant 1.000000e+00 : f32
    %126 = vector.broadcast %cst_42 : f32 to vector<32x256xf32>
    %127 = arith.subf %126, %125 : vector<32x256xf32>
    %128 = arith.mulf %99, %127 : vector<32x256xf32>
    %cst_43 = arith.constant 1.000000e+00 : f32
    %129 = vector.broadcast %cst_43 : f32 to vector<32x256xf32>
    %130 = arith.addf %129, %128 : vector<32x256xf32>
    %131 = arith.mulf %92, %130 : vector<32x256xf32>
    %132 = arith.truncf %131 : vector<32x256xf32> to vector<32x256xbf16>
    %c0_44 = arith.constant 0 : index
    %c0_45 = arith.constant 0 : index
    %133 = vector.load %arg11[%c0_44, %c0_45] : memref<256x128xbf16, #tpu.memory_space<vmem>>, vector<256x128xbf16>
    %cst_46 = arith.constant dense<0.000000e+00> : vector<32x128xf32>
    %134 = tpu.matmul %132, %133, %cst_46 {dimension_numbers = #tpu.dot_dimension_numbers<[1], [0], [0], [1], [0, 0, 1, 1], [], []>} : vector<32x256xbf16>, vector<256x128xbf16>, vector<32x128xf32> -> vector<32x128xf32>
    %c0_47 = arith.constant 0 : index
    %c0_48 = arith.constant 0 : index
    %135 = vector.load %arg12[%c0_47, %c0_48] : memref<1x128xf32, #tpu.memory_space<vmem>>, vector<1x128xf32>
    %136 = vector.broadcast %135 : vector<1x128xf32> to vector<32x128xf32>
    %137 = arith.addf %134, %136 : vector<32x128xf32>
    %138 = arith.addf %84, %137 : vector<32x128xf32>
    %c0_49 = arith.constant 0 : index
    %c0_50 = arith.constant 0 : index
    %139 = vector.load %arg7[%c0_49, %c0_50] : memref<1x128xf32, #tpu.memory_space<vmem>>, vector<1x128xf32>
    %c0_51 = arith.constant 0 : index
    %c0_52 = arith.constant 0 : index
    %140 = vector.load %arg8[%c0_51, %c0_52] : memref<1x128xf32, #tpu.memory_space<vmem>>, vector<1x128xf32>
    %cst_53 = arith.constant dense<0.000000e+00> : vector<128xf32>
    %141 = vector.multi_reduction <add>, %138, %cst_53 [0] : vector<32x128xf32> to vector<128xf32>
    %142 = vector.shape_cast %141 : vector<128xf32> to vector<1x128xf32>
    %cst_54 = arith.constant 3.200000e+01 : f32
    %143 = vector.broadcast %cst_54 : f32 to vector<1x128xf32>
    %144 = arith.divf %142, %143 : vector<1x128xf32>
    %145 = vector.broadcast %144 : vector<1x128xf32> to vector<32x128xf32>
    %146 = arith.subf %138, %145 : vector<32x128xf32>
    %147 = arith.mulf %146, %146 : vector<32x128xf32>
    %cst_55 = arith.constant dense<0.000000e+00> : vector<128xf32>
    %148 = vector.multi_reduction <add>, %147, %cst_55 [0] : vector<32x128xf32> to vector<128xf32>
    %149 = vector.shape_cast %148 : vector<128xf32> to vector<1x128xf32>
    %cst_56 = arith.constant 3.200000e+01 : f32
    %150 = vector.broadcast %cst_56 : f32 to vector<1x128xf32>
    %151 = arith.divf %149, %150 : vector<1x128xf32>
    %cst_57 = arith.constant 9.99999974E-6 : f32
    %152 = vector.broadcast %cst_57 : f32 to vector<1x128xf32>
    %153 = arith.addf %151, %152 : vector<1x128xf32>
    %154 = math.rsqrt %153 : vector<1x128xf32>
    %155 = vector.broadcast %154 : vector<1x128xf32> to vector<32x128xf32>
    %156 = arith.mulf %146, %155 : vector<32x128xf32>
    %157 = vector.broadcast %139 : vector<1x128xf32> to vector<32x128xf32>
    %158 = arith.mulf %156, %157 : vector<32x128xf32>
    %159 = vector.broadcast %140 : vector<1x128xf32> to vector<32x128xf32>
    %160 = arith.addf %158, %159 : vector<32x128xf32>
    %c0_58 = arith.constant 0 : index
    %c0_59 = arith.constant 0 : index
    %161 = vector.load %arg13[%c0_58, %c0_59] : memref<32x128xf32, #tpu.memory_space<vmem>>, vector<32x128xf32>
    tpu.vector_store %arg13[%c0_58, %c0_59], %160 {strides = array<i32>} : memref<32x128xf32, #tpu.memory_space<vmem>>, vector<32x128xf32>,
    return
  }
}

</mosaic_0001>

<bundles_post_ra>
// kernel: tst_encoder_layer.1
= control target key start
LH: loop header
LB: loop body
LE: loop exit
PB: predicated region body
PF: predicated region fallthrough
CT: control target
= control target key end

     0   :  { %18 = vsyncpa [#allocation3], 0  ;;  %s3448_s0 = inlined_call_operand.vmem [shape: f32[32,128], index: 0, kind: input, shape index: {}, may-alias: {0,13}]   ;;  %s3449_s1 = inlined_call_operand.hbm [shape: bf16[128,384], index: 1, kind: input, shape index: {}]   ;;  %s3450_s2 = inlined_call_operand.vmem [shape: f32[1,384], index: 2, kind: input, shape index: {}]   ;;  %s3451_s3 = inlined_call_operand.hbm [shape: bf16[128,128], index: 3, kind: input, shape index: {}]   ;;  %s3452_s4 = inlined_call_operand.vmem [shape: f32[1,128], index: 4, kind: input, shape index: {}]   ;;  %s3453_s5 = inlined_call_operand.vmem [shape: f32[1,128], index: 5, kind: input, shape index: {}]   ;;  %s3454_s6 = inlined_call_operand.vmem [shape: f32[1,128], index: 6, kind: input, shape index: {}]   ;;  %s3455_s7 = inlined_call_operand.vmem [shape: f32[1,128], index: 7, kind: input, shape index: {}]   ;;  %s3456_s8 = inlined_call_operand.vmem [shape: f32[1,128], index: 8, kind: input, shape index: {}]   ;;  %s3457_s9 = inlined_call_operand.hbm [shape: bf16[128,256], index: 9, kind: input, shape index: {}]   ;;  %s3458_s10 = inlined_call_operand.vmem [shape: f32[1,256], index: 10, kind: input, shape index: {}]   ;;  %s3459_s11 = inlined_call_operand.hbm [shape: bf16[256,128], index: 11, kind: input, shape index: {}]   ;;  %s3460_s12 = inlined_call_operand.vmem [shape: f32[1,128], index: 12, kind: input, shape index: {}]   ;;  %s3461_s13 = inlined_call_operand.vmem [shape: f32[32,128], index: 13, kind: output, shape index: {}, may-alias: {0,13}]  }
   0x1   :  { %19 = vsyncpa [#allocation5], 0 }
   0x2   :  { %20 = vsyncpa [#allocation8], 0  ;;  %s2808_s25 = smov [#allocation4]  }
   0x3   :  { %s42_s26 = sshll.u32 %s2808_s25, 4  ;;  %s43_s26 = int_to_ptr.vmem [resolvable:$true] %s42_s26 }
   0x4   :  { %s2730_s27 = scalar_lea.vmem %s43_s26, 1024  ;;  %p2735_p1 = scmp.lt.s32.totalorder %s43_s26, %s43_s26 }
   0x5   :  { %p2731_p0 = scmp.ne.s32.totalorder %s43_s26, %s2730_s27  ;;  %p2736_p2 = scmp.lt.s32.totalorder %s2730_s27, %s2730_s27 }
   0x7   :  { %p2737_p3 = por %p2736_p2, %p2735_p1 }
   0x9   :  { %p2738_p4 = pnand %p2737_p3, %p2731_p0 }
   0xb   :  { %2741 = shalt.err (!%p2738_p4)
}
   0xc   :  { %s2809_s28 = smov 64   ;;  %s2810_s29 = smov 4  }
   0xd   :  { %48 = dma.hbm_to_vmem [thread:$0]  %s3451_s3, 1024, %s43_s26, [#allocation5], %s2809_s28, %s2809_s28, %s2810_s29  }
   0xe   :  { %s2811_s15 = smov [#allocation2]  }
   0xf   :  { %s28_s16 = sshll.u32 %s2811_s15, 4  ;;  %s29_s16 = int_to_ptr.vmem [resolvable:$true] %s28_s16 }
  0x10   :  { %s2750_s17 = scalar_lea.vmem %s29_s16, 3072  ;;  %p2755_p6 = scmp.lt.s32.totalorder %s29_s16, %s29_s16 }
  0x11   :  { %p2751_p5 = scmp.ne.s32.totalorder %s29_s16, %s2750_s17  ;;  %p2756_p7 = scmp.lt.s32.totalorder %s2750_s17, %s2750_s17 }
  0x13   :  { %p2757_p8 = por %p2756_p7, %p2755_p6 }
  0x15   :  { %p2758_p9 = pnand %p2757_p8, %p2751_p5 }
  0x17   :  { %2761 = shalt.err (!%p2758_p9)
}
  0x18   :  { %s2812_s18 = smov 192   ;;  %s2813_s19 = smov 12  }
  0x19   :  { %34 = dma.hbm_to_vmem [thread:$0]  %s3449_s1, 3072, %s29_s16, [#allocation3], %s2812_s18, %s2812_s18, %s2813_s19  }
  0x1a   :  { %s2814_s22 = smov [#allocation6]  }
  0x1b   :  { %s64_s23 = sshll.u32 %s2814_s22, 4  ;;  %s65_s23 = int_to_ptr.vmem [resolvable:$true] %s64_s23 }
  0x1c   :  { %s2770_s3 = scalar_lea.vmem %s65_s23, 2048  ;;  %p2775_p11 = scmp.lt.s32.totalorder %s65_s23, %s65_s23 }
  0x1d   :  { %p2771_p10 = scmp.ne.s32.totalorder %s65_s23, %s2770_s3  ;;  %p2776_p12 = scmp.lt.s32.totalorder %s2770_s3, %s2770_s3 }
  0x1f   :  { %p2777_p13 = por %p2776_p12, %p2775_p11 }
  0x21   :  { %p2778_p0 = pnand %p2777_p13, %p2771_p10 }
  0x23   :  { %2781 = shalt.err (!%p2778_p0)
}
  0x24   :  { %s2815_s24 = smov 128   ;;  %s2816_s25 = smov 8  }
  0x25   :  { %70 = dma.hbm_to_vmem [thread:$0]  %s3457_s9, 2048, %s65_s23, [#allocation5], %s2815_s24, %s2815_s24, %s2816_s25  }
  0x26   :  { %s2817_s30 = smov [#allocation7]  }
  0x27   :  { %s78_s14 = sshll.u32 %s2817_s30, 4  ;;  %s79_s14 = int_to_ptr.vmem [resolvable:$true] %s78_s14 }
  0x28   :  { %s2790_s1 = scalar_lea.vmem %s79_s14, 2048  ;;  %p2795_p2 = scmp.lt.s32.totalorder %s79_s14, %s79_s14 }
  0x29   :  { %p2791_p1 = scmp.ne.s32.totalorder %s79_s14, %s2790_s1  ;;  %p2796_p3 = scmp.lt.s32.totalorder %s2790_s1, %s2790_s1 }
  0x2b   :  { %p2797_p4 = por %p2796_p3, %p2795_p2 }
  0x2d   :  { %p2798_p5 = pnand %p2797_p4, %p2791_p1 }
  0x2f   :  { %2801 = shalt.err (!%p2798_p5)
}
  0x30   :  { %84 = dma.hbm_to_vmem [thread:$0]  %s3459_s11, 2048, %s79_s14, [#allocation8], %s2809_s28, %s2809_s28, %s2810_s29  }
  0x31   :  { %2802 = dma.done.wait [#allocation3], 3072  }
  0x32   :  { %2803 = vsyncadd [#allocation3], 4294964224 }
  0x33   :  { %2804 = dma.done.wait [#allocation5], 3072  }
  0x34   :  { %2805 = vsyncadd [#allocation5], 4294964224 }
  0x35   :  { %2806 = dma.done.wait [#allocation8], 2048  }
  0x36   :  { %2807 = vsyncadd [#allocation8], 4294965248  ;;  %v2818_v0 = vmov 0   ;;  %v2538_v1 = vld [vmem:[#allocation2 + $0xac] ss:$12 sps:$4 sm:$0xff]   ;;  %v100_v8 = vld [vmem:[%s3448_s0] sm:$0xff]  ;;  %v140_v32 = vlaneseq }
  0x37   :  { %315 = vmatprep.mubr.bf16.mxu0 %v2818_v0  ;;  %v2540_v2 = vld [vmem:[#allocation2 + $0xa8] ss:$12 sps:$4 sm:$0xff]   ;;  %283 = vmatprep.subr.bf16.mxu0 %v2538_v1  ;;  %v2543_v4 = vld [vmem:[#allocation2 + $0x90] ss:$12 sps:$4 sm:$0xff]   ;;  %v2546_v6 = vld [vmem:[#allocation2 + $0x78] ss:$12 sps:$4 sm:$0xff]  }
  0x38   :  { %v2541_v3 = vld [vmem:[#allocation2 + $0x94] ss:$12 sps:$4 sm:$0xff]   ;;  %284 = vmatpush1.bf16.msra.mxu0 %v2540_v2  ;;  %v2544_v5 = vld [vmem:[#allocation2 + $0x7c] ss:$12 sps:$4 sm:$0xff]   ;;  %v2547_v7 = vld [vmem:[#allocation2 + $0x64] ss:$12 sps:$4 sm:$0xff]  }
  0x39   :  { %285 = vmatprep.subr.bf16.mxu0 %v2541_v3  ;;  %v2549_v9 = vld [vmem:[#allocation2 + $0x60] ss:$12 sps:$4 sm:$0xff]   ;;  %v2552_v13 = vld [vmem:[#allocation2 + $0x48] ss:$12 sps:$4 sm:$0xff]   ;;  %v2555_v15 = vld [vmem:[#allocation2 + $0x30] ss:$12 sps:$4 sm:$0xff]  }
  0x3a   :  { %v101_v10 = vld [vmem:[%s3448_s0 + $0x8] sm:$0xff]  ;;  %v2553_v14 = vld [vmem:[#allocation2 + $0x34] ss:$12 sps:$4 sm:$0xff]   ;;  %v2558_v17 = vld [vmem:[#allocation2 + $0x18] ss:$12 sps:$4 sm:$0xff]   ;;  %v2819_v23 = vmov 0.0  }
  0x3b   :  { %v2550_v11 = vld [vmem:[#allocation2 + $0x4c] ss:$12 sps:$4 sm:$0xff]   ;;  %v104_v12 = vpack.c.bf16 %v101_v10, %v100_v8  ;;  %v2556_v16 = vld [vmem:[#allocation2 + $0x1c] ss:$12 sps:$4 sm:$0xff]   ;;  %v2559_v18 = vld [vmem:[#allocation2 + $0x4] ss:$12 sps:$4 sm:$0xff]  }
  0x3c   :  { %286 = vmatpush1.bf16.msra.mxu0 %v2543_v4  ;;  %v2561_v19 = vld [vmem:[#allocation2] ss:$12 sps:$4 sm:$0xff]   ;;  %v102_v20 = vld [vmem:[%s3448_s0 + $0x10] sm:$0xff]  ;;  %v103_v21 = vld [vmem:[%s3448_s0 + $0x18] sm:$0xff]  ;;  %vm2820_vm0 = vmmov 0   ;;  %v2932_v33 = vshrl.u32 %v140_v32, 7 }
  0x3d   :  { %287 = vmatprep.subr.bf16.mxu0 %v2544_v5  ;;  %2402 = vmatprep.mubr.bf16.mxu1 %v104_v12  ;;  %v105_v22 = vpack.c.bf16 %v103_v21, %v102_v20  ;;  %v2562_v24 = vld [vmem:[#allocation2 + $0xb0] ss:$12 sps:$4 sm:$0xff]   ;;  %v2563_v25 = vld [vmem:[#allocation2 + $0x98] ss:$12 sps:$4 sm:$0xff]   ;;  %v2564_v26 = vld [vmem:[#allocation2 + $0x80] ss:$12 sps:$4 sm:$0xff]  }
  0x3e   :  { %2386 = vmatprep.subr.bf16.mxu1 %v2562_v24  ;;  %v2565_v27 = vld [vmem:[#allocation2 + $0x68] ss:$12 sps:$4 sm:$0xff]   ;;  %v2566_v28 = vld [vmem:[#allocation2 + $0x50] ss:$12 sps:$4 sm:$0xff]   ;;  %v2567_v29 = vld [vmem:[#allocation2 + $0x38] ss:$12 sps:$4 sm:$0xff]  }
  0x3f   :  { %2387 = vmatpush3.bf16.msra.mxu1 %v2562_v24  ;;  %v2568_v30 = vld [vmem:[#allocation2 + $0x20] ss:$12 sps:$4 sm:$0xff]   ;;  %v2569_v31 = vld [vmem:[#allocation2 + $0x8] ss:$12 sps:$4 sm:$0xff]   ;;  %v142_v34 = vsub.s32 0, %v2932_v33  ;;  %v146_v36 = vsub.s32 1, %v2932_v33 }
  0x40   :  { %288 = vmatpush1.bf16.msra.mxu0 %v2546_v6  ;;  %2388 = vmatprep.subr.bf16.mxu1 %v2563_v25  ;;  %v2938_v35 = vld [vmem:[%s3450_s2] sm:$0x7]  ;;  %vm439_vm1 = vcmask 261120   ;;  %s2821_s2 = smov 96   ;;  %s2822_s3 = smov 32   ;;  %vm816_vm2 = vcmask 130048  }
  0x41   :  { %289 = vmatprep.subr.bf16.mxu0 %v2547_v7  ;;  %v143_v38 = vrot.slane %v2938_v35, %v142_v34  ;;  %v147_v40 = vrot.slane %v2938_v35, %v146_v36  ;;  %v150_v7 = vsub.s32 2, %v2932_v33  ;;  %vm1385_vm3 = vcmask 523264  }
  0x42   :  { %vm1390_vm4 = vcmask 785408  }
  0x43   :  { %2389 = vmatpush3.bf16.msra.mxu1 %v2563_v25 }
  0x44   :  { %290 = vmatpush1.bf16.msra.mxu0 %v2549_v9  ;;  %2390 = vmatprep.subr.bf16.mxu1 %v2564_v26 }
  0x45   :  { %291 = vmatprep.subr.bf16.mxu0 %v2550_v11 }
  0x47   :  { %2391 = vmatpush3.bf16.msra.mxu1 %v2564_v26 }
  0x48   :  { %292 = vmatpush1.bf16.msra.mxu0 %v2552_v13  ;;  %2392 = vmatprep.subr.bf16.mxu1 %v2565_v27 }
  0x49   :  { %293 = vmatprep.subr.bf16.mxu0 %v2553_v14 }
  0x4b   :  { %2393 = vmatpush3.bf16.msra.mxu1 %v2565_v27 }
  0x4c   :  { %294 = vmatpush1.bf16.msra.mxu0 %v2555_v15  ;;  %2394 = vmatprep.subr.bf16.mxu1 %v2566_v28 }
  0x4d   :  { %295 = vmatprep.subr.bf16.mxu0 %v2556_v16 }
  0x4f   :  { %2395 = vmatpush3.bf16.msra.mxu1 %v2566_v28 }
  0x50   :  { %296 = vmatpush1.bf16.msra.mxu0 %v2558_v17  ;;  %2396 = vmatprep.subr.bf16.mxu1 %v2567_v29 }
  0x51   :  { %297 = vmatprep.subr.bf16.mxu0 %v2559_v18 }
  0x53   :  { %2397 = vmatpush3.bf16.msra.mxu1 %v2567_v29 }
  0x54   :  { %298 = vmatpush1.bf16.msra.mxu0 %v2561_v19  ;;  %2398 = vmatprep.subr.bf16.mxu1 %v2568_v30 }
  0x55   :  { %2406 = vmatprep.subr.bf16.mxu0 %v2819_v23 }
  0x57   :  { %316 = vmatmul.mubr.bf16.vlgmr.msra.gmra.mxu0 %v104_v12  ;;  %2399 = vmatpush3.bf16.msra.mxu1 %v2568_v30  ;;  %v151_v12 = vrot.slane %v2938_v35, %v150_v7 }
  0x58   :  { %325 = vmatprep.mubr.bf16.mxu0 %v2818_v0  ;;  %2400 = vmatprep.subr.bf16.mxu1 %v2569_v31 }
  0x5b   :  { %2401 = vmatpush3.bf16.msra.mxu1 %v2569_v31 }
  0x5c   :  { %2418 = vmatprep.subr.bf16.mxu1 %v2819_v23 }
  0x5e   :  { %2403 = vmatmul.mubr.bf16.vlgmr.msra.gmra.mxu1 %v105_v22 }
  0x5f   :  { %326 = vmatmul.mubr.bf16.gmra.mxu0 %v105_v22  ;;  %2420 = vmatprep.mubr.msk.bf16.mxu1 %vm2820_vm0, %v2819_v23 }
  0x60   :  { %2408 = vmatprep.mubr.msk.bf16.mxu0 %vm2820_vm0, %v2819_v23 }
 0x117   :  { %v317_v37 = vpop.f32.mrf.mxu0 }
 0x118   :  { %v318_v42 = vadd.f32 %v317_v37, %v143_v38 }
 0x119   :  { %v319_v39 = vpop.f32.mrf.mxu0 }
 0x11a   :  { %v320_v45 = vadd.f32 %v319_v39, %v147_v40 }
 0x11b   :  { %v321_v41 = vpop.f32.mrf.mxu0 }
 0x11c   :  { %v322_v43 = vadd.f32 %v321_v41, %v143_v38 }
 0x11d   :  { %v323_v44 = vpop.f32.mrf.mxu0 }
 0x11e   :  { %v385_v46 = vpack.c.bf16 %v322_v43, %v318_v42  ;;  %v324_v47 = vadd.f32 %v323_v44, %v147_v40  ;;  %v2404_v6 = vpop.f32.mrf.mxu1 }
 0x11f   :  { %v327_v48 = vpop.f32.mrf.mxu0  ;;  %v379_v25 = vadd.f32 %v2404_v6, %v151_v12 }
 0x120   :  { %v386_v49 = vpack.c.bf16 %v324_v47, %v320_v45  ;;  %393 = vrot.lane.b32.xlu1 %v385_v46, %s2821_s2  ;;  %v328_v58 = vadd.f32 %v327_v48, %v143_v38  ;;  %v370_v8 = vpop.f32.mrf.mxu1 }
 0x121   :  { %v329_v50 = vpop.f32.mrf.mxu0  ;;  %v371_v17 = vadd.f32 %v370_v8, %v151_v12 }
 0x122   :  { %407 = vrot.lane.b32.xlu0 %v386_v49, %s2821_s2  ;;  %v444_v51 = vsel %vm439_vm1, %v386_v49, 0  ;;  %v330_v54 = vadd.f32 %v329_v50, %v147_v40  ;;  %v2405_v10 = vpop.f32.mrf.mxu1 }
 0x123   :  { %v331_v52 = vpop.f32.mrf.mxu0  ;;  %2407 = vmatpush3.bf16.xpose.msra.mxu0 %v444_v51  ;;  %v382_v26 = vadd.f32 %v2405_v10, %v151_v12 }
 0x124   :  { %411 = vrot.lane.b32.xlu1 %v386_v49, %s2809_s28  ;;  %2412 = vmatprep.subr.bf16.mxu0 %v2819_v23  ;;  %v332_v56 = vadd.f32 %v331_v52, %v143_v38  ;;  %v373_v14 = vpop.f32.mrf.mxu1 }
 0x125   :  { %v333_v53 = vpop.f32.mrf.mxu0  ;;  %v374_v18 = vadd.f32 %v373_v14, %v151_v12  ;;  %v3002_v27 = vpack.c.bf16 %v382_v26, %v379_v25 }
 0x126   :  { %v334_v55 = vadd.f32 %v333_v53, %v147_v40  ;;  %v388_v60 = vpack.c.bf16 %v332_v56, %v328_v58 }
 0x127   :  { %v2990_v21 = vpack.c.bf16 %v374_v18, %v371_v17 }
 0x128   :  { %v389_v57 = vpack.c.bf16 %v334_v55, %v330_v54 }
 0x12a   :  { %409 = vrot.lane.b32.xlu0 %v389_v57, %s2821_s2  ;;  %413 = vrot.lane.b32.xlu1 %v389_v57, %s2809_s28  ;;  %v491_v59 = vsel %vm439_vm1, %v389_v57, 0 }
 0x12b   :  { %2409 = vmatmul.mubr.msk.bf16.vlgmr.msra.gmra.mxu0 %vm439_vm1, %v385_v46 }
 0x12c   :  { %2413 = vmatpush3.bf16.xpose.msra.mxu0 %v491_v59  ;;  %2414 = vmatprep.mubr.msk.bf16.mxu0 %vm2820_vm0, %v2819_v23 }
 0x12d   :  { %2424 = vmatprep.subr.bf16.mxu0 %v2819_v23 }
 0x12e   :  { %395 = vrot.lane.b32.xlu0 %v388_v60, %s2821_s2  ;;  %415 = vrot.lane.b32.xlu1 %v386_v49, %s2822_s3 }
 0x132   :  { %397 = vrot.lane.b32.xlu0 %v385_v46, %s2809_s28  ;;  %417 = vrot.lane.b32.xlu1 %v389_v57, %s2822_s3 }
 0x133   :  { %2415 = vmatmul.mubr.msk.bf16.vlgmr.msra.gmra.mxu0 %vm439_vm1, %v388_v60 }
 0x134   :  { %2426 = vmatprep.mubr.msk.bf16.mxu0 %vm2820_vm0, %v2819_v23 }
 0x136   :  { %399 = vrot.lane.b32.xlu0 %v388_v60, %s2809_s28  ;;  %403 = vrot.lane.b32.xlu1 %v388_v60, %s2822_s3 }
 0x13a   :  { %401 = vrot.lane.b32.xlu0 %v385_v46, %s2822_s3 }
 0x192   :  { %v394_v61 = vpop.permute.xlu1 %393 }
 0x194   :  { %v408_v62 = vpop.permute.xlu0 %407 }
 0x195   :  { %v538_v63 = vsel %vm439_vm1, %v408_v62, 0 }
 0x196   :  { %2419 = vmatpush3.bf16.xpose.msra.mxu1 %v538_v63  ;;  %v412_v1 = vpop.permute.xlu1 %411 }
 0x197   :  { %2430 = vmatprep.subr.bf16.mxu1 %v2819_v23  ;;  %v632_v4 = vsel %vm439_vm1, %v412_v1, 0 }
 0x19c   :  { %v410_v2 = vpop.permute.xlu0 %409  ;;  %v414_v3 = vpop.permute.xlu1 %413 }
 0x19d   :  { %v585_v5 = vsel %vm439_vm1, %v410_v2, 0  ;;  %2421 = vmatmul.mubr.msk.bf16.vlgmr.msra.gmra.mxu1 %vm439_vm1, %v394_v61  ;;  %v679_v15 = vsel %vm439_vm1, %v414_v3, 0 }
 0x19e   :  { %2425 = vmatpush3.bf16.xpose.msra.mxu0 %v585_v5  ;;  %2431 = vmatpush3.bf16.xpose.msra.mxu1 %v632_v4 }
 0x19f   :  { %2432 = vmatprep.mubr.msk.bf16.mxu1 %vm2820_vm0, %v2819_v23  ;;  %2436 = vmatprep.subr.bf16.mxu0 %v2819_v23 }
 0x1a0   :  { %v396_v9 = vpop.permute.xlu0 %395  ;;  %2442 = vmatprep.subr.bf16.mxu1 %v2819_v23  ;;  %v416_v11 = vpop.permute.xlu1 %415 }
 0x1a1   :  { %v726_v16 = vsel %vm439_vm1, %v416_v11, 0 }
 0x1a4   :  { %v398_v13 = vpop.permute.xlu0 %397  ;;  %v418_v20 = vpop.permute.xlu1 %417 }
 0x1a5   :  { %2427 = vmatmul.mubr.msk.bf16.vlgmr.msra.gmra.mxu0 %vm439_vm1, %v396_v9  ;;  %2433 = vmatmul.mubr.msk.bf16.vlgmr.msra.gmra.mxu1 %vm439_vm1, %v398_v13  ;;  %v773_v24 = vsel %vm439_vm1, %v418_v20, 0 }
 0x1a6   :  { %2437 = vmatpush3.bf16.xpose.msra.mxu0 %v679_v15  ;;  %2443 = vmatpush3.bf16.xpose.msra.mxu1 %v726_v16 }
 0x1a7   :  { %2438 = vmatprep.mubr.msk.bf16.mxu0 %vm2820_vm0, %v2819_v23  ;;  %2444 = vmatprep.mubr.msk.bf16.mxu1 %vm2820_vm0, %v2819_v23 }
 0x1a8   :  { %v400_v19 = vpop.permute.xlu0 %399  ;;  %2448 = vmatprep.subr.bf16.mxu0 %v2819_v23  ;;  %2454 = vmatprep.subr.bf16.mxu1 %v2819_v23  ;;  %v404_v28 = vpop.permute.xlu1 %403 }
 0x1ac   :  { %v402_v22 = vpop.permute.xlu0 %401 }
 0x1ad   :  { %2439 = vmatmul.mubr.msk.bf16.vlgmr.msra.gmra.mxu0 %vm439_vm1, %v400_v19  ;;  %2445 = vmatmul.mubr.msk.bf16.vlgmr.msra.gmra.mxu1 %vm439_vm1, %v402_v22 }
 0x1ae   :  { %2449 = vmatpush3.bf16.xpose.msra.mxu0 %v773_v24  ;;  %2450 = vmatprep.mubr.msk.bf16.mxu0 %vm2820_vm0, %v2819_v23 }
 0x1af   :  { %2460 = vmatprep.subr.bf16.mxu0 %v2819_v23  ;;  %2455 = vmatpush3.bf16.msra.mxu1 %v2990_v21 }
 0x1b0   :  { %2456 = vmatprep.mubr.msk.bf16.mxu1 %vm2820_vm0, %v2819_v23  ;;  %2466 = vmatprep.subr.bf16.mxu1 %v2819_v23 }
 0x1b5   :  { %2451 = vmatmul.mubr.msk.bf16.vlgmr.msra.gmra.mxu0 %vm439_vm1, %v404_v28 }
 0x1b6   :  { %2461 = vmatpush3.bf16.msra.mxu0 %v3002_v27  ;;  %2462 = vmatprep.mubr.msk.bf16.mxu0 %vm2820_vm0, %v2819_v23 }
 0x1b7   :  { %2472 = vmatprep.subr.bf16.mxu0 %v2819_v23 }
 0x1eb   :  { %v3009_v29 = vpop.f32.mrf.mxu0 }
 0x1ec   :  { %v817_v30 = vsel %vm816_vm2, %v3009_v29, -inf }
 0x1ed   :  { %818 = vmax.xlane.f32.xlu0 %v817_v30  ;;  %v2410_v31 = vpop.f32.mrf.mxu0 }
 0x1ef   :  { %v3013_v32 = vpop.f32.mrf.mxu0 }
 0x1f0   :  { %v820_v35 = vsel %vm816_vm2, %v3013_v32, -inf }
 0x1f1   :  { %821 = vmax.xlane.f32.xlu1 %v820_v35  ;;  %v2411_v37 = vpop.f32.mrf.mxu0 }
 0x1f3   :  { %v3017_v38 = vpop.f32.mrf.mxu0 }
 0x1f4   :  { %v823_v39 = vsel %vm816_vm2, %v3017_v38, -inf }
 0x1f5   :  { %824 = vmax.xlane.f32.xlu0 %v823_v39  ;;  %v2416_v40 = vpop.f32.mrf.mxu0 }
 0x1f7   :  { %v3021_v41 = vpop.f32.mrf.mxu0 }
 0x1f8   :  { %v826_v42 = vsel %vm816_vm2, %v3021_v41, -inf }
 0x1f9   :  { %827 = vmax.xlane.f32.xlu0 %v826_v42  ;;  %v2417_v43 = vpop.f32.mrf.mxu0 }
 0x25d   :  { %v3025_v44 = vpop.f32.mrf.mxu1 }
 0x25e   :  { %v829_v45 = vsel %vm816_vm2, %v3025_v44, -inf }
 0x25f   :  { %v2422_v46 = vpop.f32.mrf.mxu1  ;;  %830 = vmax.xlane.f32.xlu1 %v829_v45 }
 0x261   :  { %v3029_v47 = vpop.f32.mrf.mxu1 }
 0x262   :  { %v832_v48 = vsel %vm816_vm2, %v3029_v47, -inf }
 0x263   :  { %v2423_v49 = vpop.f32.mrf.mxu1  ;;  %833 = vmax.xlane.f32.xlu0 %v832_v48 }
 0x265   :  { %v3033_v50 = vpop.f32.mrf.mxu0  ;;  %v3035_v51 = vpop.f32.mrf.mxu1 }
 0x266   :  { %v835_v52 = vsel %vm816_vm2, %v3033_v50, -inf  ;;  %v841_v57 = vsel %vm816_vm2, %v3035_v51, -inf }
 0x267   :  { %v2434_v53 = vpop.f32.mrf.mxu1  ;;  %836 = vmax.xlane.f32.xlu1 %v835_v52  ;;  %v2428_v54 = vpop.f32.mrf.mxu0 }
 0x269   :  { %v3039_v55 = vpop.f32.mrf.mxu0  ;;  %v3041_v56 = vpop.f32.mrf.mxu1 }
 0x26a   :  { %v838_v58 = vsel %vm816_vm2, %v3039_v55, -inf  ;;  %v844_v63 = vsel %vm816_vm2, %v3041_v56, -inf }
 0x26b   :  { %v2435_v59 = vpop.f32.mrf.mxu1  ;;  %842 = vmax.xlane.f32.xlu1 %v841_v57  ;;  %839 = vmax.xlane.f32.xlu0 %v838_v58  ;;  %v2429_v60 = vpop.f32.mrf.mxu0 }
 0x26d   :  { %v3047_v61 = vpop.f32.mrf.mxu0  ;;  %v3049_v62 = vpop.f32.mrf.mxu1 }
 0x26e   :  { %v847_v1 = vsel %vm816_vm2, %v3047_v61, -inf  ;;  %v853_v6 = vsel %vm816_vm2, %v3049_v62, -inf }
 0x26f   :  { %v2446_v2 = vpop.f32.mrf.mxu1  ;;  %845 = vmax.xlane.f32.xlu0 %v844_v63  ;;  %848 = vmax.xlane.f32.xlu1 %v847_v1  ;;  %v2440_v3 = vpop.f32.mrf.mxu0 }
 0x271   :  { %v3055_v4 = vpop.f32.mrf.mxu0  ;;  %v3057_v5 = vpop.f32.mrf.mxu1 }
 0x272   :  { %v850_v7 = vsel %vm816_vm2, %v3055_v4, -inf  ;;  %v856_v11 = vsel %vm816_vm2, %v3057_v5, -inf }
 0x273   :  { %v2447_v8 = vpop.f32.mrf.mxu1  ;;  %854 = vmax.xlane.f32.xlu1 %v853_v6  ;;  %851 = vmax.xlane.f32.xlu0 %v850_v7  ;;  %v2441_v9 = vpop.f32.mrf.mxu0 }
 0x275   :  { %v3063_v10 = vpop.f32.mrf.mxu0 }
 0x276   :  { %v859_v12 = vsel %vm816_vm2, %v3063_v10, -inf  ;;  %v819_v17 = vpop.xlane.xlu0 %818 }
 0x277   :  { %857 = vmax.xlane.f32.xlu0 %v856_v11  ;;  %860 = vmax.xlane.f32.xlu1 %v859_v12  ;;  %v2452_v13 = vpop.f32.mrf.mxu0  ;;  %v865_v24 = vsub.f32 %v3009_v29, %v819_v17 }
 0x279   :  { %v3069_v14 = vpop.f32.mrf.mxu0  ;;  %v881_v28 = vmul.f32 1.442695, %v865_v24 }
 0x27a   :  { %v862_v15 = vsel %vm816_vm2, %v3069_v14, -inf  ;;  %v822_v19 = vpop.xlane.xlu1 %821 }
 0x27b   :  { %863 = vmax.xlane.f32.xlu0 %v862_v15  ;;  %v2453_v16 = vpop.f32.mrf.mxu0  ;;  %v866_v20 = vsub.f32 %v3013_v32, %v822_v19 }
 0x27d   :  { %v883_v25 = vmul.f32 1.442695, %v866_v20 }
 0x27e   :  { %v825_v18 = vpop.xlane.xlu0 %824 }
 0x27f   :  { %2618 = vpow2.f32 %v883_v25  ;;  %v867_v30 = vsub.f32 %v3017_v38, %v825_v18 }
 0x280   :  { %2620 = vpow2.f32 %v881_v28 }
 0x281   :  { %v885_v35 = vmul.f32 1.442695, %v867_v30 }
 0x282   :  { %v828_v22 = vpop.xlane.xlu0 %827 }
 0x283   :  { %v868_v26 = vsub.f32 %v3021_v41, %v828_v22 }
 0x285   :  { %v887_v31 = vmul.f32 1.442695, %v868_v26 }
 0x287   :  { %2622 = vpow2.f32 %v887_v31 }
 0x288   :  { %421 = vrot.lane.b32.xlu1 %v2990_v21, %s2821_s2  ;;  %2624 = vpow2.f32 %v885_v35 }
 0x28c   :  { %427 = vrot.lane.b32.xlu1 %v2990_v21, %s2809_s28  ;;  %v3085_v37 = vpop.eup %2618 }
 0x28d   :  { %v3087_v39 = vpop.eup %2620  ;;  %v916_v32 = vsel %vm816_vm2, %v3085_v37, 0.0 }
 0x28e   :  { %v913_v40 = vsel %vm816_vm2, %v3087_v39, 0.0 }
 0x290   :  { %429 = vrot.lane.b32.xlu1 %v3002_v27, %s2809_s28 }
 0x291   :  { %423 = vrot.lane.b32.xlu0 %v3002_v27, %s2821_s2 }
 0x294   :  { %v3091_v29 = vpop.eup %2622 }
 0x295   :  { %v922_v38 = vsel %vm816_vm2, %v3091_v29, 0.0  ;;  %v3097_v41 = vpop.eup %2624 }
 0x296   :  { %v919_v42 = vsel %vm816_vm2, %v3097_v41, 0.0 }
 0x2b0   :  { %917 = vadd.xlane.f32.xlu0 %v916_v32 }
 0x2b4   :  { %914 = vadd.xlane.f32.xlu1 %v913_v40  ;;  %923 = vadd.xlane.f32.xlu0 %v922_v38 }
 0x2b8   :  { %920 = vadd.xlane.f32.xlu1 %v919_v42 }
 0x2e8   :  { %v831_v43 = vpop.xlane.xlu1 %830 }
 0x2e9   :  { %v869_v45 = vsub.f32 %v3025_v44, %v831_v43 }
 0x2eb   :  { %v889_v46 = vmul.f32 1.442695, %v869_v45 }
 0x2ec   :  { %v834_v48 = vpop.xlane.xlu0 %833 }
 0x2ed   :  { %2626 = vpow2.f32 %v889_v46  ;;  %v870_v49 = vsub.f32 %v3029_v47, %v834_v48 }
 0x2ef   :  { %v891_v52 = vmul.f32 1.442695, %v870_v49 }
 0x2f0   :  { %v837_v53 = vpop.xlane.xlu1 %836 }
 0x2f1   :  { %2628 = vpow2.f32 %v891_v52  ;;  %v871_v54 = vsub.f32 %v3033_v50, %v837_v53 }
 0x2f3   :  { %v893_v57 = vmul.f32 1.442695, %v871_v54 }
 0x2f4   :  { %v843_v58 = vpop.xlane.xlu1 %842  ;;  %v840_v59 = vpop.xlane.xlu0 %839 }
 0x2f5   :  { %2630 = vpow2.f32 %v893_v57  ;;  %v873_v60 = vsub.f32 %v3035_v51, %v843_v58  ;;  %v872_v63 = vsub.f32 %v3039_v55, %v840_v59 }
 0x2f7   :  { %v897_v1 = vmul.f32 1.442695, %v873_v60  ;;  %v895_v44 = vmul.f32 1.442695, %v872_v63 }
 0x2f8   :  { %v846_v2 = vpop.xlane.xlu0 %845  ;;  %v849_v3 = vpop.xlane.xlu1 %848 }
 0x2f9   :  { %2632 = vpow2.f32 %v897_v1  ;;  %v874_v47 = vsub.f32 %v3041_v56, %v846_v2  ;;  %v875_v6 = vsub.f32 %v3047_v61, %v849_v3 }
 0x2fa   :  { %v3108_v7 = vpop.eup %2626  ;;  %2634 = vpow2.f32 %v895_v44 }
 0x2fb   :  { %v899_v50 = vmul.f32 1.442695, %v874_v47  ;;  %v901_v8 = vmul.f32 1.442695, %v875_v6  ;;  %v925_v9 = vsel %vm816_vm2, %v3108_v7, 0.0 }
 0x2fc   :  { %v855_v51 = vpop.xlane.xlu1 %854  ;;  %v852_v11 = vpop.xlane.xlu0 %851  ;;  %926 = vadd.xlane.f32.xlu1 %v925_v9 }
 0x2fd   :  { %2636 = vpow2.f32 %v899_v50  ;;  %v877_v55 = vsub.f32 %v3049_v62, %v855_v51  ;;  %v876_v12 = vsub.f32 %v3055_v4, %v852_v11 }
 0x2fe   :  { %v3114_v13 = vpop.eup %2628  ;;  %2638 = vpow2.f32 %v901_v8 }
 0x2ff   :  { %v905_v56 = vmul.f32 1.442695, %v877_v55  ;;  %v903_v61 = vmul.f32 1.442695, %v876_v12  ;;  %v928_v15 = vsel %vm816_vm2, %v3114_v13, 0.0 }
 0x300   :  { %v858_v16 = vpop.xlane.xlu0 %857  ;;  %v861_v17 = vpop.xlane.xlu1 %860  ;;  %929 = vadd.xlane.f32.xlu0 %v928_v15 }
 0x301   :  { %2640 = vpow2.f32 %v905_v56  ;;  %v878_v18 = vsub.f32 %v3057_v5, %v858_v16  ;;  %v879_v19 = vsub.f32 %v3063_v10, %v861_v17 }
 0x302   :  { %v3120_v20 = vpop.eup %2630  ;;  %2642 = vpow2.f32 %v903_v61 }
 0x303   :  { %v907_v62 = vmul.f32 1.442695, %v878_v18  ;;  %v909_v4 = vmul.f32 1.442695, %v879_v19  ;;  %v931_v22 = vsel %vm816_vm2, %v3120_v20, 0.0 }
 0x304   :  { %932 = vadd.xlane.f32.xlu1 %v931_v22  ;;  %v864_v24 = vpop.xlane.xlu0 %863  ;;  %v422_v54 = vpop.permute.xlu1 %421 }
 0x305   :  { %2644 = vpow2.f32 %v907_v62  ;;  %v880_v25 = vsub.f32 %v3069_v14, %v864_v24 }
 0x306   :  { %v3125_v26 = vpop.eup %2632  ;;  %2646 = vpow2.f32 %v909_v4 }
 0x307   :  { %v3127_v28 = vpop.eup %2634  ;;  %v911_v5 = vmul.f32 1.442695, %v880_v25  ;;  %v937_v10 = vsel %vm816_vm2, %v3125_v26, 0.0 }
 0x308   :  { %938 = vadd.xlane.f32.xlu1 %v937_v10  ;;  %v934_v30 = vsel %vm816_vm2, %v3127_v28, 0.0  ;;  %v428_v57 = vpop.permute.xlu1 %427  ;;  %v424_v58 = vpop.permute.xlu0 %423 }
 0x309   :  { %2648 = vpow2.f32 %v911_v5  ;;  %935 = vadd.xlane.f32.xlu0 %v934_v30 }
 0x30a   :  { %v3133_v31 = vpop.eup %2636 }
 0x30b   :  { %v3135_v35 = vpop.eup %2638  ;;  %v940_v14 = vsel %vm816_vm2, %v3133_v31, 0.0 }
 0x30c   :  { %v943_v32 = vsel %vm816_vm2, %v3135_v35, 0.0  ;;  %v3165_v59 = vpop.permute.xlu1 %429 }
 0x30d   :  { %944 = vadd.xlane.f32.xlu1 %v943_v32  ;;  %941 = vadd.xlane.f32.xlu0 %v940_v14 }
 0x30e   :  { %v3141_v40 = vpop.eup %2640 }
 0x30f   :  { %v3143_v38 = vpop.eup %2642  ;;  %v949_v42 = vsel %vm816_vm2, %v3141_v40, 0.0 }
 0x310   :  { %v946_v43 = vsel %vm816_vm2, %v3143_v38, 0.0 }
 0x311   :  { %950 = vadd.xlane.f32.xlu1 %v949_v42  ;;  %947 = vadd.xlane.f32.xlu0 %v946_v43 }
 0x312   :  { %v3149_v45 = vpop.eup %2644 }
 0x313   :  { %v3151_v46 = vpop.eup %2646  ;;  %v952_v48 = vsel %vm816_vm2, %v3149_v45, 0.0 }
 0x314   :  { %v955_v49 = vsel %vm816_vm2, %v3151_v46, 0.0 }
 0x315   :  { %956 = vadd.xlane.f32.xlu1 %v955_v49  ;;  %953 = vadd.xlane.f32.xlu0 %v952_v48 }
 0x316   :  { %v3157_v52 = vpop.eup %2648 }
 0x317   :  { %v958_v53 = vsel %vm816_vm2, %v3157_v52, 0.0 }
 0x319   :  { %959 = vadd.xlane.f32.xlu0 %v958_v53 }
 0x326   :  { %435 = vrot.lane.b32.xlu1 %v3002_v27, %s2822_s3 }
 0x32f   :  { %433 = vrot.lane.b32.xlu0 %v2990_v21, %s2822_s3 }
 0x339   :  { %v918_v60 = vpop.xlane.xlu0 %917 }
 0x33a   :  { %2650 = vrcp.f32 %v918_v60 }
 0x33d   :  { %v915_v63 = vpop.xlane.xlu1 %914  ;;  %v924_v1 = vpop.xlane.xlu0 %923 }
 0x33e   :  { %2652 = vrcp.f32 %v915_v63 }
 0x33f   :  { %2654 = vrcp.f32 %v924_v1 }
 0x341   :  { %v921_v44 = vpop.xlane.xlu1 %920 }
 0x342   :  { %2656 = vrcp.f32 %v921_v44  ;;  %v2571_v44 = vld [vmem:[#allocation4 + $0x30] sm:$0xff]  }
 0x347   :  { %v2651_v2 = vpop.eup %2650 }
 0x348   :  { %v964_v47 = vmul.f32 %v2651_v2, %v3085_v37 }
 0x34b   :  { %v2653_v3 = vpop.eup %2652 }
 0x34c   :  { %v962_v27 = vmul.f32 %v2653_v3, %v3087_v39  ;;  %v2655_v6 = vpop.eup %2654 }
 0x34d   :  { %v968_v9 = vmul.f32 %v2655_v6, %v3091_v29 }
 0x34e   :  { %v993_v21 = vpack.c.bf16 %v964_v47, %v962_v27 }
 0x34f   :  { %v2657_v50 = vpop.eup %2656 }
 0x350   :  { %2457 = vmatmul.mubr.msk.bf16.vlgmr.msra.gmra.mxu1 %vm816_vm2, %v993_v21  ;;  %v966_v8 = vmul.f32 %v2657_v50, %v3097_v41  ;;  %v2572_v50 = vld [vmem:[#allocation4 + $0x28] sm:$0xff]  }
 0x351   :  { %2467 = vmatpush3.bf16.msra.mxu1 %v422_v54  ;;  %2468 = vmatprep.mubr.msk.bf16.mxu1 %vm2820_vm0, %v2819_v23 }
 0x352   :  { %v994_v51 = vpack.c.bf16 %v968_v9, %v966_v8  ;;  %2478 = vmatprep.subr.bf16.mxu1 %v2819_v23  ;;  %v2573_v8 = vld [vmem:[#allocation4 + $0x20] sm:$0xff]  }
 0x354   :  { %2463 = vmatmul.mubr.msk.bf16.vlgmr.msra.gmra.mxu0 %vm816_vm2, %v994_v51 }
 0x355   :  { %2473 = vmatpush3.bf16.msra.mxu0 %v424_v58  ;;  %2474 = vmatprep.mubr.msk.bf16.mxu0 %vm2820_vm0, %v2819_v23 }
 0x356   :  { %2484 = vmatprep.subr.bf16.mxu0 %v2819_v23 }
 0x385   :  { %v927_v37 = vpop.xlane.xlu1 %926 }
 0x386   :  { %2658 = vrcp.f32 %v927_v37  ;;  %v2574_v37 = vld [vmem:[#allocation4 + $0x18] sm:$0xff]  }
 0x389   :  { %v930_v39 = vpop.xlane.xlu0 %929 }
 0x38a   :  { %2660 = vrcp.f32 %v930_v39 }
 0x38d   :  { %v933_v29 = vpop.xlane.xlu1 %932 }
 0x38e   :  { %2662 = vrcp.f32 %v933_v29 }
 0x391   :  { %v939_v41 = vpop.xlane.xlu1 %938 }
 0x392   :  { %v936_v11 = vpop.xlane.xlu0 %935 }
 0x393   :  { %2664 = vrcp.f32 %v936_v11  ;;  %v2659_v55 = vpop.eup %2658  ;;  %v2575_v11 = vld [vmem:[#allocation4 + $0x10] sm:$0xff]  }
 0x394   :  { %2666 = vrcp.f32 %v939_v41  ;;  %v970_v15 = vmul.f32 %v2659_v55, %v3108_v7 }
 0x396   :  { %v945_v12 = vpop.xlane.xlu1 %944  ;;  %v942_v56 = vpop.xlane.xlu0 %941 }
 0x397   :  { %v2661_v61 = vpop.eup %2660  ;;  %2668 = vrcp.f32 %v942_v56  ;;  %v2576_v56 = vld [vmem:[#allocation4 + $0x8] sm:$0xff]  }
 0x398   :  { %v972_v16 = vmul.f32 %v2661_v61, %v3114_v13  ;;  %2670 = vrcp.f32 %v945_v12 }
 0x39a   :  { %v951_v17 = vpop.xlane.xlu1 %950  ;;  %v948_v18 = vpop.xlane.xlu0 %947  ;;  %v995_v19 = vpack.c.bf16 %v972_v16, %v970_v15 }
 0x39b   :  { %2672 = vrcp.f32 %v948_v18  ;;  %v2663_v62 = vpop.eup %2662  ;;  %v2577_v18 = vld [vmem:[#allocation4] sm:$0xff]  }
 0x39c   :  { %2469 = vmatmul.mubr.msk.bf16.vlgmr.msra.gmra.mxu1 %vm816_vm2, %v995_v19  ;;  %2674 = vrcp.f32 %v951_v17  ;;  %v974_v13 = vmul.f32 %v2663_v62, %v3120_v20 }
 0x39d   :  { %2479 = vmatpush3.bf16.msra.mxu1 %v428_v57  ;;  %2480 = vmatprep.mubr.msk.bf16.mxu1 %vm2820_vm0, %v2819_v23 }
 0x39e   :  { %v957_v4 = vpop.xlane.xlu1 %956  ;;  %v954_v22 = vpop.xlane.xlu0 %953  ;;  %2490 = vmatprep.subr.bf16.mxu1 %v2819_v23 }
 0x39f   :  { %2676 = vrcp.f32 %v954_v22 }
 0x3a0   :  { %v2665_v7 = vpop.eup %2664  ;;  %2678 = vrcp.f32 %v957_v4 }
 0x3a1   :  { %v976_v24 = vmul.f32 %v2665_v7, %v3127_v28  ;;  %v2667_v5 = vpop.eup %2666 }
 0x3a2   :  { %v960_v25 = vpop.xlane.xlu0 %959  ;;  %v978_v14 = vmul.f32 %v2667_v5, %v3125_v26  ;;  %v436_v57 = vpop.permute.xlu1 %435 }
 0x3a3   :  { %2680 = vrcp.f32 %v960_v25  ;;  %v996_v10 = vpack.c.bf16 %v976_v24, %v974_v13 }
 0x3a4   :  { %v2669_v30 = vpop.eup %2668 }
 0x3a5   :  { %2475 = vmatmul.mubr.msk.bf16.vlgmr.msra.gmra.mxu0 %vm816_vm2, %v996_v10  ;;  %v980_v32 = vmul.f32 %v2669_v30, %v3133_v31  ;;  %v2671_v42 = vpop.eup %2670 }
 0x3a6   :  { %2485 = vmatpush3.bf16.msra.mxu0 %v3165_v59  ;;  %2486 = vmatprep.mubr.msk.bf16.mxu0 %vm2820_vm0, %v2819_v23  ;;  %v434_v43 = vpop.permute.xlu0 %433  ;;  %v982_v48 = vmul.f32 %v2671_v42, %v3135_v35 }
 0x3a7   :  { %2496 = vmatprep.subr.bf16.mxu0 %v2819_v23  ;;  %v997_v20 = vpack.c.bf16 %v980_v32, %v978_v14 }
 0x3a8   :  { %v2673_v28 = vpop.eup %2672 }
 0x3a9   :  { %2481 = vmatmul.mubr.msk.bf16.vlgmr.msra.gmra.mxu1 %vm816_vm2, %v997_v20  ;;  %v984_v49 = vmul.f32 %v2673_v28, %v3143_v38  ;;  %v2675_v53 = vpop.eup %2674 }
 0x3aa   :  { %2491 = vmatpush3.bf16.msra.mxu1 %v434_v43  ;;  %2492 = vmatprep.mubr.msk.bf16.mxu1 %vm2820_vm0, %v2819_v23  ;;  %v986_v58 = vmul.f32 %v2675_v53, %v3141_v40  ;;  %v2570_v40 = vld [vmem:[#allocation4 + $0x38] sm:$0xff]  }
 0x3ab   :  { %v998_v26 = vpack.c.bf16 %v984_v49, %v982_v48  ;;  %2502 = vmatprep.subr.bf16.mxu1 %v2570_v40 }
 0x3ac   :  { %v2677_v31 = vpop.eup %2676 }
 0x3ad   :  { %v2679_v54 = vpop.eup %2678  ;;  %2487 = vmatmul.mubr.msk.bf16.vlgmr.msra.gmra.mxu0 %vm816_vm2, %v998_v26  ;;  %v988_v59 = vmul.f32 %v2677_v31, %v3149_v45 }
 0x3ae   :  { %2497 = vmatpush3.bf16.msra.mxu0 %v436_v57  ;;  %2498 = vmatprep.mubr.msk.bf16.mxu0 %vm2820_vm0, %v2819_v23  ;;  %v990_v60 = vmul.f32 %v2679_v54, %v3151_v46 }
 0x3af   :  { %v999_v38 = vpack.c.bf16 %v988_v59, %v986_v58 }
 0x3b0   :  { %v2681_v35 = vpop.eup %2680 }
 0x3b1   :  { %v992_v63 = vmul.f32 %v2681_v35, %v3157_v52  ;;  %2493 = vmatmul.mubr.msk.bf16.vlgmr.msra.gmra.mxu1 %vm816_vm2, %v999_v38 }
 0x3b2   :  { %2503 = vmatpush3.bf16.msra.mxu1 %v2570_v40  ;;  %v2580_v40 = vld [vmem:[#allocation6 + $0x74] ss:$8 sps:$4 sm:$0xff]  }
 0x3b3   :  { %v1000_v1 = vpack.c.bf16 %v992_v63, %v990_v60  ;;  %2504 = vmatprep.subr.bf16.mxu1 %v2571_v44  ;;  %1692 = vmatprep.subr.bf16.mxu0 %v2580_v40 }
 0x3b5   :  { %2499 = vmatmul.mubr.msk.bf16.vlgmr.msra.gmra.mxu0 %vm816_vm2, %v1000_v1 }
 0x3b6   :  { %1724 = vmatprep.mubr.bf16.mxu0 %v2818_v0  ;;  %2505 = vmatpush3.bf16.msra.mxu1 %v2571_v44  ;;  %v2578_v44 = vld [vmem:[#allocation6 + $0x70] ss:$8 sps:$4 sm:$0xff]  }
 0x3b7   :  { %2506 = vmatprep.subr.bf16.mxu1 %v2572_v50  ;;  %1693 = vmatpush1.bf16.msra.mxu0 %v2578_v44 }
 0x3ba   :  { %2507 = vmatpush3.bf16.msra.mxu1 %v2572_v50  ;;  %v2598_v50 = vld [vmem:[#allocation6 + $0x14] ss:$8 sps:$4 sm:$0xff]  }
 0x3bb   :  { %2508 = vmatprep.subr.bf16.mxu1 %v2573_v8 }
 0x3be   :  { %2509 = vmatpush3.bf16.msra.mxu1 %v2573_v8  ;;  %v2596_v8 = vld [vmem:[#allocation6 + $0x10] ss:$8 sps:$4 sm:$0xff]  }
 0x3bf   :  { %2510 = vmatprep.subr.bf16.mxu1 %v2574_v37 }
 0x3c2   :  { %2511 = vmatpush3.bf16.msra.mxu1 %v2574_v37 }
 0x3c3   :  { %2512 = vmatprep.subr.bf16.mxu1 %v2575_v11 }
 0x3c6   :  { %2513 = vmatpush3.bf16.msra.mxu1 %v2575_v11 }
 0x3c7   :  { %2514 = vmatprep.subr.bf16.mxu1 %v2576_v56 }
 0x3ca   :  { %2515 = vmatpush3.bf16.msra.mxu1 %v2576_v56 }
 0x3cb   :  { %2516 = vmatprep.subr.bf16.mxu1 %v2577_v18 }
 0x3ce   :  { %2517 = vmatpush3.bf16.msra.mxu1 %v2577_v18  ;;  %v2721_v18 = vld [vmem:[%s3448_s0 + $0x18] sm:$0xff] }
 0x410   :  { %v3209_v23 = vpop.f32.mrf.mxu1 }
 0x412   :  { %v2458_v45 = vpop.f32.mrf.mxu1 }
 0x413   :  { %v2581_v45 = vld [vmem:[#allocation6 + $0x60] ss:$8 sps:$4 sm:$0xff]  }
 0x414   :  { %v3211_v2 = vpop.f32.mrf.mxu1  ;;  %v3213_v46 = vpop.f32.mrf.mxu0 }
 0x415   :  { %v1353_v52 = vpack.c.bf16 %v3211_v2, %v3209_v23  ;;  %v2583_v23 = vld [vmem:[#allocation6 + $0x64] ss:$8 sps:$4 sm:$0xff]   ;;  %v2586_v2 = vld [vmem:[#allocation6 + $0x54] ss:$8 sps:$4 sm:$0xff]  }
 0x416   :  { %v2459_v3 = vpop.f32.mrf.mxu1  ;;  %v2464_v27 = vpop.f32.mrf.mxu0  ;;  %1694 = vmatprep.subr.bf16.mxu0 %v2583_v23 }
 0x417   :  { %1695 = vmatpush1.bf16.msra.mxu0 %v2581_v45  ;;  %v2589_v3 = vld [vmem:[#allocation6 + $0x44] ss:$8 sps:$4 sm:$0xff]   ;;  %v2592_v27 = vld [vmem:[#allocation6 + $0x34] ss:$8 sps:$4 sm:$0xff]   ;;  %v2269_v45 = vld [vmem:[%s3453_s5] ss:$0 sm:$0xff] }
 0x418   :  { %v3217_v47 = vpop.f32.mrf.mxu0  ;;  %1696 = vmatprep.subr.bf16.mxu0 %v2586_v2 }
 0x419   :  { %v1354_v6 = vpack.c.bf16 %v3217_v47, %v3213_v46  ;;  %v2587_v46 = vld [vmem:[#allocation6 + $0x40] ss:$8 sps:$4 sm:$0xff]   ;;  %v2590_v47 = vld [vmem:[#allocation6 + $0x30] ss:$8 sps:$4 sm:$0xff]  }
 0x41a   :  { %v2465_v21 = vpop.f32.mrf.mxu0 }
 0x41b   :  { %v2593_v21 = vld [vmem:[#allocation6 + $0x20] ss:$8 sps:$4 sm:$0xff]  }
 0x45c   :  { %v1126_v9 = vpop.f32.mrf.mxu1 }
 0x45e   :  { %v2470_v51 = vpop.f32.mrf.mxu1 }
 0x45f   :  { %v2601_v51 = vld [vmem:[#allocation6 + $0x4] ss:$8 sps:$4 sm:$0xff]  }
 0x460   :  { %v1129_v39 = vpop.f32.mrf.mxu1 }
 0x461   :  { %v1355_v29 = vpack.c.bf16 %v1129_v39, %v1126_v9  ;;  %v2599_v9 = vld [vmem:[#allocation6] ss:$8 sps:$4 sm:$0xff]  }
 0x462   :  { %v2471_v41 = vpop.f32.mrf.mxu1 }
 0x463   :  { %1363 = vrot.lane.b32.xlu0 %v1355_v29, %s2822_s3  ;;  %v2718_v41 = vld [vmem:[%s3448_s0] sm:$0xff] }
 0x465   :  { %v1170_v55 = vpop.f32.mrf.mxu0 }
 0x467   :  { %v2476_v12 = vpop.f32.mrf.mxu0 }
 0x468   :  { %v2719_v12 = vld [vmem:[%s3448_s0 + $0x10] sm:$0xff] }
 0x469   :  { %v1173_v61 = vpop.f32.mrf.mxu0  ;;  %v1214_v16 = vpop.f32.mrf.mxu1 }
 0x46a   :  { %v1356_v15 = vpack.c.bf16 %v1173_v61, %v1170_v55  ;;  %v2720_v61 = vld [vmem:[%s3448_s0 + $0x8] sm:$0xff] }
 0x46b   :  { %v2477_v17 = vpop.f32.mrf.mxu0  ;;  %v2482_v19 = vpop.f32.mrf.mxu1 }
 0x46c   :  { %1365 = vrot.lane.b32.xlu1 %v1356_v15, %s2822_s3 }
 0x46d   :  { %v1217_v62 = vpop.f32.mrf.mxu1  ;;  %v1258_v4 = vpop.f32.mrf.mxu0 }
 0x46e   :  { %v1357_v22 = vpack.c.bf16 %v1217_v62, %v1214_v16  ;;  %v2268_v16 = vld [vmem:[%s3452_s4] ss:$0 sm:$0xff] }
 0x46f   :  { %v2483_v7 = vpop.f32.mrf.mxu1  ;;  %v2488_v13 = vpop.f32.mrf.mxu0 }
 0x470   :  { %1369 = vrot.lane.b32.xlu0 %v1357_v22, %s2809_s28 }
 0x471   :  { %v1261_v24 = vpop.f32.mrf.mxu0  ;;  %v1302_v25 = vpop.f32.mrf.mxu1 }
 0x472   :  { %v1358_v5 = vpack.c.bf16 %v1261_v24, %v1258_v4 }
 0x473   :  { %v2489_v10 = vpop.f32.mrf.mxu0  ;;  %v2494_v30 = vpop.f32.mrf.mxu1 }
 0x474   :  { %1371 = vrot.lane.b32.xlu1 %v1358_v5, %s2809_s28 }
 0x475   :  { %v1305_v14 = vpop.f32.mrf.mxu1  ;;  %v1346_v32 = vpop.f32.mrf.mxu0 }
 0x476   :  { %v1359_v42 = vpack.c.bf16 %v1305_v14, %v1302_v25 }
 0x477   :  { %v2495_v20 = vpop.f32.mrf.mxu1  ;;  %v2500_v28 = vpop.f32.mrf.mxu0 }
 0x478   :  { %1375 = vrot.lane.b32.xlu0 %v1359_v42, %s2821_s2 }
 0x479   :  { %v1349_v43 = vpop.f32.mrf.mxu0 }
 0x47a   :  { %v1360_v48 = vpack.c.bf16 %v1349_v43, %v1346_v32 }
 0x47b   :  { %v2501_v49 = vpop.f32.mrf.mxu0 }
 0x47c   :  { %1377 = vrot.lane.b32.xlu1 %v1360_v48, %s2821_s2 }
 0x4d5   :  { %v1364_v53 = vpop.permute.xlu0 %1363 }
 0x4d6   :  { %v1381_v54 = vsel %vm439_vm1, %v1353_v52, %v1364_v53  ;;  %v2584_v52 = vld [vmem:[#allocation6 + $0x50] ss:$8 sps:$4 sm:$0xff]  }
 0x4d7   :  { %1697 = vmatpush1.bf16.msra.mxu0 %v2584_v52 }
 0x4d8   :  { %1698 = vmatprep.subr.bf16.mxu0 %v2589_v3  ;;  %v2270_v3 = vld [vmem:[%s3454_s6] ss:$0 sm:$0xff] }
 0x4db   :  { %1699 = vmatpush1.bf16.msra.mxu0 %v2587_v46 }
 0x4dc   :  { %1700 = vmatprep.subr.bf16.mxu0 %v2592_v27 }
 0x4de   :  { %v1366_v26 = vpop.permute.xlu1 %1365 }
 0x4df   :  { %v1384_v38 = vsel %vm439_vm1, %v1354_v6, %v1366_v26  ;;  %1701 = vmatpush1.bf16.msra.mxu0 %v2590_v47  ;;  %v2595_v6 = vld [vmem:[#allocation6 + $0x24] ss:$8 sps:$4 sm:$0xff]  }
 0x4e0   :  { %1702 = vmatprep.subr.bf16.mxu0 %v2595_v6 }
 0x4e2   :  { %v1370_v31 = vpop.permute.xlu0 %1369 }
 0x4e3   :  { %v1387_v57 = vsel %vm1385_vm3, %v1381_v54, %v1370_v31  ;;  %1703 = vmatpush1.bf16.msra.mxu0 %v2593_v21 }
 0x4e4   :  { %1704 = vmatprep.subr.bf16.mxu0 %v2598_v50 }
 0x4e6   :  { %v1372_v58 = vpop.permute.xlu1 %1371 }
 0x4e7   :  { %v1389_v60 = vsel %vm1385_vm3, %v1384_v38, %v1372_v58  ;;  %1705 = vmatpush1.bf16.msra.mxu0 %v2596_v8 }
 0x4e8   :  { %1706 = vmatprep.subr.bf16.mxu0 %v2601_v51 }
 0x4ea   :  { %v1376_v59 = vpop.permute.xlu0 %1375 }
 0x4eb   :  { %v1392_v35 = vsel %vm1390_vm4, %v1387_v57, %v1376_v59  ;;  %1707 = vmatpush1.bf16.msra.mxu0 %v2599_v9 }
 0x4ec   :  { %2518 = vmatprep.mubr.bf16.mxu1 %v1392_v35 }
 0x4ee   :  { %v1378_v63 = vpop.permute.xlu1 %1377 }
 0x4ef   :  { %v1395_v1 = vsel %vm1390_vm4, %v1389_v60, %v1378_v63 }
 0x4f0   :  { %2519 = vmatmul.mubr.bf16.vlgmr.msra.gmra.mxu1 %v1395_v1 }
 0x5b0   :  { %v2520_v37 = vpop.f32.mrf.mxu1 }
 0x5b1   :  { %v1512_v56 = vadd.f32 %v2719_v12, %v2520_v37  ;;  %v2605_v12 = vld [vmem:[#allocation7 + $0x30] sm:$0xff]  }
 0x5b2   :  { %v1495_v39 = vpop.f32.mrf.mxu1 }
 0x5b3   :  { %v1510_v11 = vadd.f32 %v2718_v41, %v1495_v39  ;;  %v1523_v4 = vadd.f32 %v2268_v16, %v1512_v56  ;;  %v2602_v41 = vld [vmem:[#allocation7 + $0x78] sm:$0xff]   ;;  %v2606_v56 = vld [vmem:[#allocation7 + $0x68] sm:$0xff]  }
 0x5b4   :  { %v2521_v29 = vpop.f32.mrf.mxu1  ;;  %2358 = vmatprep.subr.bf16.mxu1 %v2602_v41 }
 0x5b5   :  { %v1521_v17 = vadd.f32 %v2268_v16, %v1510_v11  ;;  %v1513_v19 = vadd.f32 %v2721_v18, %v2521_v29  ;;  %v2603_v11 = vld [vmem:[#allocation7 + $0x38] sm:$0xff]   ;;  %v2612_v18 = vld [vmem:[#allocation7 + $0x50] sm:$0xff]  }
 0x5b6   :  { %v1498_v55 = vpop.f32.mrf.mxu1  ;;  %2359 = vmatpush3.bf16.msra.mxu1 %v2603_v11 }
 0x5b7   :  { %v1511_v15 = vadd.f32 %v2720_v61, %v1498_v55  ;;  %v1524_v7 = vadd.f32 %v2268_v16, %v1513_v19  ;;  %v2604_v55 = vld [vmem:[#allocation7 + $0x70] sm:$0xff]   ;;  %v2607_v61 = vld [vmem:[#allocation7 + $0x28] sm:$0xff]  }
 0x5b8   :  { %2360 = vmatprep.subr.bf16.mxu1 %v2604_v55  ;;  %v2613_v19 = vld [vmem:[#allocation7 + $0x10] sm:$0xff]  }
 0x5b9   :  { %v1522_v62 = vadd.f32 %v2268_v16, %v1511_v15  ;;  %v2609_v15 = vld [vmem:[#allocation7 + $0x20] sm:$0xff]   ;;  %v2610_v16 = vld [vmem:[#allocation7 + $0x58] sm:$0xff]  }
 0x5ba   :  { %2361 = vmatpush3.bf16.msra.mxu1 %v2605_v12 }
 0x5bb   :  { %v1527_v22 = vadd.f32 %v1522_v62, %v1521_v17  ;;  %2362 = vmatprep.subr.bf16.mxu1 %v2606_v56 }
 0x5bd   :  { %v1528_v13 = vadd.f32 %v1527_v22, %v1523_v4  ;;  %v2616_v22 = vld [vmem:[#allocation7 + $0x40] sm:$0xff]  }
 0x5be   :  { %2363 = vmatpush3.bf16.msra.mxu1 %v2607_v61 }
 0x5bf   :  { %v1529_v24 = vadd.f32 %v1528_v13, %v1524_v7  ;;  %v1600_v13 = vld [vmem:[%s3458_s10] sm:$0x3] }
 0x5c1   :  { %v1530_v25 = vrot.slane %v1529_v24, 4 }
 0x5c3   :  { %v1531_v5 = vadd.f32 %v1530_v25, %v1529_v24  ;;  %v1605_v24 = vrot.slane %v1600_v13, %v142_v34  ;;  %v1609_v25 = vrot.slane %v1600_v13, %v146_v36 }
 0x5c5   :  { %v1532_v10 = vrot.slane %v1531_v5, 2 }
 0x5c7   :  { %v1533_v30 = vadd.f32 %v1532_v10, %v1531_v5 }
 0x5c9   :  { %v1534_v14 = vrot.slane %v1533_v30, 1 }
 0x5cb   :  { %v1535_v32 = vadd.f32 %v1534_v14, %v1533_v30 }
 0x5cd   :  { %v1537_v42 = vmul.f32 0.03125, %v1535_v32 }
 0x5cf   :  { %v1538_v20 = vsub.f32 %v1521_v17, %v1537_v42  ;;  %v1539_v28 = vsub.f32 %v1522_v62, %v1537_v42  ;;  %v1540_v43 = vsub.f32 %v1523_v4, %v1537_v42  ;;  %v1541_v48 = vsub.f32 %v1524_v7, %v1537_v42  ;;  %v2611_v17 = vld [vmem:[#allocation7 + $0x18] sm:$0xff]   ;;  %v2614_v62 = vld [vmem:[#allocation7 + $0x48] sm:$0xff]   ;;  %v2617_v7 = vld [vmem:[#allocation7] sm:$0xff]  }
 0x5d0   :  { %v2615_v4 = vld [vmem:[#allocation7 + $0x8] sm:$0xff]  }
 0x5d1   :  { %v1542_v49 = vmul.f32 %v1538_v20, %v1538_v20  ;;  %v1543_v53 = vmul.f32 %v1539_v28, %v1539_v28  ;;  %v1544_v26 = vmul.f32 %v1540_v43, %v1540_v43  ;;  %v1545_v54 = vmul.f32 %v1541_v48, %v1541_v48 }
 0x5d3   :  { %v1546_v31 = vadd.f32 %v1543_v53, %v1542_v49 }
 0x5d5   :  { %v1547_v57 = vadd.f32 %v1546_v31, %v1544_v26 }
 0x5d7   :  { %v1548_v58 = vadd.f32 %v1547_v57, %v1545_v54 }
 0x5d9   :  { %v1549_v59 = vrot.slane %v1548_v58, 4 }
 0x5db   :  { %v1550_v35 = vadd.f32 %v1549_v59, %v1548_v58 }
 0x5dd   :  { %v1551_v38 = vrot.slane %v1550_v35, 2 }
 0x5df   :  { %v1552_v60 = vadd.f32 %v1551_v38, %v1550_v35 }
 0x5e1   :  { %v1553_v63 = vrot.slane %v1552_v60, 1 }
 0x5e3   :  { %v1554_v1 = vadd.f32 %v1553_v63, %v1552_v60 }
 0x5e5   :  { %v1555_v40 = vmul.f32 0.03125, %v1554_v1 }
 0x5e7   :  { %v1556_v44 = vadd.f32 1e-05, %v1555_v40 }
 0x5e9   :  { %2682 = vrsqrt.f32 %v1556_v44 }
 0x5f6   :  { %v2683_v23 = vpop.eup %2682 }
 0x5f7   :  { %v1559_v2 = vmul.f32 %v2683_v23, %v1539_v28  ;;  %v1558_v52 = vmul.f32 %v2683_v23, %v1538_v20  ;;  %v1560_v47 = vmul.f32 %v2683_v23, %v1540_v43  ;;  %v1561_v6 = vmul.f32 %v2683_v23, %v1541_v48 }
 0x5f9   :  { %v1569_v46 = vmul.f32 %v2269_v45, %v1559_v2  ;;  %v1568_v27 = vmul.f32 %v2269_v45, %v1558_v52  ;;  %v1570_v9 = vmul.f32 %v2269_v45, %v1560_v47  ;;  %v1571_v51 = vmul.f32 %v2269_v45, %v1561_v6 }
 0x5fb   :  { %v3256_v21 = vadd.f32 %v2270_v3, %v1568_v27  ;;  %v3258_v50 = vadd.f32 %v2270_v3, %v1569_v46  ;;  %v3263_v37 = vadd.f32 %v2270_v3, %v1570_v9  ;;  %v3265_v39 = vadd.f32 %v2270_v3, %v1571_v51 }
 0x5fd   :  { %v1582_v8 = vpack.c.bf16 %v3258_v50, %v3256_v21  ;;  %v1583_v29 = vpack.c.bf16 %v3265_v39, %v3263_v37 }
 0x5ff   :  { %1725 = vmatmul.mubr.bf16.vlgmr.msra.gmra.mxu0 %v1582_v8 }
 0x600   :  { %1734 = vmatprep.mubr.bf16.mxu0 %v2818_v0  ;;  %v2608_v0 = vld [vmem:[#allocation7 + $0x60] sm:$0xff]  }
 0x601   :  { %2364 = vmatprep.subr.bf16.mxu1 %v2608_v0 }
 0x602   :  { %2365 = vmatpush3.bf16.msra.mxu1 %v2609_v15 }
 0x603   :  { %2366 = vmatprep.subr.bf16.mxu1 %v2610_v16 }
 0x606   :  { %2367 = vmatpush3.bf16.msra.mxu1 %v2611_v17 }
 0x607   :  { %1735 = vmatmul.mubr.bf16.gmra.mxu0 %v1583_v29  ;;  %2368 = vmatprep.subr.bf16.mxu1 %v2612_v18 }
 0x60a   :  { %2369 = vmatpush3.bf16.msra.mxu1 %v2613_v19 }
 0x60b   :  { %2370 = vmatprep.subr.bf16.mxu1 %v2614_v62 }
 0x60e   :  { %2371 = vmatpush3.bf16.msra.mxu1 %v2615_v4 }
 0x60f   :  { %2372 = vmatprep.subr.bf16.mxu1 %v2616_v22 }
 0x612   :  { %2373 = vmatpush3.bf16.msra.mxu1 %v2617_v7 }
 0x6bf   :  { %v1726_v5 = vpop.f32.mrf.mxu0 }
 0x6c0   :  { %v3276_v10 = vadd.f32 %v1726_v5, %v1605_v24 }
 0x6c1   :  { %v1728_v30 = vpop.f32.mrf.mxu0 }
 0x6c2   :  { %v3279_v14 = vmul.f32 0.70710677, %v3276_v10  ;;  %v3281_v32 = vadd.f32 %v1728_v30, %v1609_v25 }
 0x6c3   :  { %v1730_v42 = vpop.f32.mrf.mxu0 }
 0x6c4   :  { %v1777_v20 = vand.u32 2147483647, %v3279_v14  ;;  %v3285_v28 = vmul.f32 0.70710677, %v3281_v32  ;;  %v3287_v43 = vadd.f32 %v1730_v42, %v1605_v24  ;;  %vm1761_vm5 = vcmp.ge.f32.partialorder %v3279_v14, 0.0 }
 0x6c5   :  { %v1732_v34 = vpop.f32.mrf.mxu0 }
 0x6c6   :  { %v1785_v33 = vmul.f32 0.3275911, %v1777_v20  ;;  %v1778_v36 = vand.u32 2147483647, %v3285_v28  ;;  %v3291_v48 = vmul.f32 0.70710677, %v3287_v43  ;;  %v3293_v49 = vadd.f32 %v1732_v34, %v1609_v25 }
 0x6c7   :  { %v1736_v53 = vpop.f32.mrf.mxu0  ;;  %v1889_v23 = vsub.f32 0.0, %v1777_v20  ;;  %vm1762_vm6 = vcmp.ge.f32.partialorder %v3285_v28, 0.0 }
 0x6c8   :  { %v1793_v26 = vadd.f32 1.0, %v1785_v33  ;;  %v1786_v31 = vmul.f32 0.3275911, %v1778_v36  ;;  %v1779_v54 = vand.u32 2147483647, %v3291_v48  ;;  %v3300_v63 = vadd.f32 %v1736_v53, %v1605_v24 }
 0x6c9   :  { %v3297_v57 = vmul.f32 0.70710677, %v3293_v49  ;;  %v1738_v58 = vpop.f32.mrf.mxu0  ;;  %v1890_v3 = vsub.f32 0.0, %v1778_v36  ;;  %v1897_v6 = vmul.f32 %v1889_v23, %v1777_v20  ;;  %vm1763_vm7 = vcmp.ge.f32.partialorder %v3291_v48, 0.0 }
 0x6ca   :  { %2684 = vrcp.f32 %v1793_v26  ;;  %v1794_v59 = vadd.f32 1.0, %v1786_v31  ;;  %v1787_v35 = vmul.f32 0.3275911, %v1779_v54  ;;  %v3302_v44 = vadd.f32 %v1738_v58, %v1609_v25 }
 0x6cb   :  { %v1780_v38 = vand.u32 2147483647, %v3297_v57  ;;  %v1740_v1 = vpop.f32.mrf.mxu0  ;;  %v3305_v45 = vmul.f32 0.70710677, %v3300_v63  ;;  %v1891_v51 = vsub.f32 0.0, %v1779_v54  ;;  %v1898_v11 = vmul.f32 %v1890_v3, %v1778_v36 }
 0x6cc   :  { %2686 = vrcp.f32 %v1794_v59  ;;  %v1795_v60 = vadd.f32 1.0, %v1787_v35  ;;  %v3308_v52 = vmul.f32 0.70710677, %v3302_v44  ;;  %v3311_v27 = vadd.f32 %v1740_v1, %v1605_v24 }
 0x6cd   :  { %v1788_v40 = vmul.f32 0.3275911, %v1780_v38  ;;  %v1781_v46 = vand.u32 2147483647, %v3305_v45  ;;  %v1742_v47 = vpop.f32.mrf.mxu0  ;;  %v1905_v15 = vmul.f32 1.442695, %v1897_v6  ;;  %v1899_v18 = vmul.f32 %v1891_v51, %v1779_v54 }
 0x6ce   :  { %2688 = vrcp.f32 %v1795_v60  ;;  %v1782_v9 = vand.u32 2147483647, %v3308_v52  ;;  %v3315_v29 = vmul.f32 0.70710677, %v3311_v27  ;;  %v3317_v41 = vadd.f32 %v1742_v47, %v1609_v25 }
 0x6cf   :  { %v1796_v2 = vadd.f32 1.0, %v1788_v40  ;;  %v1789_v8 = vmul.f32 0.3275911, %v1781_v46  ;;  %v1892_v19 = vsub.f32 0.0, %v1780_v38  ;;  %v1907_v4 = vmul.f32 1.442695, %v1898_v11 }
 0x6d0   :  { %v1790_v12 = vmul.f32 0.3275911, %v1782_v9  ;;  %v1783_v56 = vand.u32 2147483647, %v3315_v29  ;;  %v3321_v61 = vmul.f32 0.70710677, %v3317_v41 }
 0x6d1   :  { %2690 = vrcp.f32 %v1796_v2  ;;  %v1797_v55 = vadd.f32 1.0, %v1789_v8  ;;  %v1893_v24 = vsub.f32 0.0, %v1781_v46  ;;  %v1909_v34 = vmul.f32 1.442695, %v1899_v18 }
 0x6d2   :  { %v1798_v16 = vadd.f32 1.0, %v1790_v12  ;;  %v1791_v62 = vmul.f32 0.3275911, %v1783_v56  ;;  %v3328_v22 = vand.u32 2147483647, %v3321_v61  ;;  %v1900_v33 = vmul.f32 %v1892_v19, %v1780_v38 }
 0x6d3   :  { %2692 = vrcp.f32 %v1797_v55  ;;  %v1894_v26 = vsub.f32 0.0, %v1782_v9  ;;  %v2823_v54 = vmov -1.0   ;;  %v1901_v35 = vmul.f32 %v1893_v24, %v1781_v46 }
 0x6d4   :  { %2694 = vrcp.f32 %v1798_v16  ;;  %v1799_v25 = vadd.f32 1.0, %v1791_v62  ;;  %v1792_v30 = vmul.f32 0.3275911, %v3328_v22  ;;  %v3342_v58 = vsel %vm1761_vm5, 1.0, %v2823_v54 }
 0x6d5   :  { %2696 = vpow2.f32 %v1905_v15  ;;  %v1895_v40 = vsub.f32 0.0, %v1783_v56  ;;  %v3351_v2 = vsel %vm1762_vm6, 1.0, %v2823_v54  ;;  %v1911_v3 = vmul.f32 1.442695, %v1900_v33 }
 0x6d6   :  { %2698 = vrcp.f32 %v1799_v25  ;;  %v1800_v31 = vadd.f32 1.0, %v1792_v30  ;;  %v1902_v6 = vmul.f32 %v1894_v26, %v1782_v9  ;;  %v1913_v11 = vmul.f32 1.442695, %v1901_v35 }
 0x6d7   :  { %v3323_v0 = vpop.eup %2684  ;;  %2700 = vpow2.f32 %v1907_v4  ;;  %v1903_v15 = vmul.f32 %v1895_v40, %v1783_v56  ;;  %v1896_v18 = vsub.f32 0.0, %v3328_v22  ;;  %v1771_v48 = vsel %vm1763_vm7, 1.0, %v2823_v54 }
 0x6d8   :  { %v1817_v17 = vmul.f32 1.0614054, %v3323_v0  ;;  %2702 = vrcp.f32 %v1800_v31  ;;  %v1915_v4 = vmul.f32 1.442695, %v1902_v6  ;;  %vm1764_vm8 = vcmp.ge.f32.partialorder %v3297_v57, 0.0 }
 0x6d9   :  { %v3330_v7 = vpop.eup %2686  ;;  %2704 = vpow2.f32 %v1909_v34  ;;  %v1904_v26 = vmul.f32 %v1896_v18, %v3328_v22  ;;  %vm1765_vm9 = vcmp.ge.f32.partialorder %v3305_v45, 0.0  ;;  %vm1766_vm10 = vcmp.ge.f32.partialorder %v3308_v52, 0.0 }
 0x6da   :  { %v1825_v13 = vadd.f32 -1.4531521, %v1817_v17  ;;  %v1818_v5 = vmul.f32 1.0614054, %v3330_v7  ;;  %2706 = vpow2.f32 %v1911_v3  ;;  %vm1767_vm11 = vcmp.ge.f32.partialorder %v3315_v29, 0.0 }
 0x6db   :  { %v3335_v42 = vpop.eup %2688  ;;  %2708 = vpow2.f32 %v1913_v11  ;;  %v1919_v11 = vmul.f32 1.442695, %v1904_v26  ;;  %v1775_v29 = vsel %vm1767_vm11, 1.0, %v2823_v54  ;;  %vm1768_vm12 = vcmp.ge.f32.partialorder %v3321_v61, 0.0 }
 0x6dc   :  { %v1833_v20 = vmul.f32 %v3323_v0, %v1825_v13  ;;  %v1826_v36 = vadd.f32 -1.4531521, %v1818_v5  ;;  %v1819_v53 = vmul.f32 1.0614054, %v3335_v42  ;;  %2710 = vpow2.f32 %v1915_v4 }
 0x6dd   :  { %v1749_v61 = vmul.f32 0.5, %v3300_v63 }
 0x6de   :  { %v1841_v59 = vadd.f32 1.4214138, %v1833_v20  ;;  %v3344_v60 = vpop.eup %2690  ;;  %v1834_v1 = vmul.f32 %v3330_v7, %v1826_v36  ;;  %v1827_v38 = vadd.f32 -1.4531521, %v1819_v53  ;;  %v1917_v20 = vmul.f32 1.442695, %v1903_v15 }
 0x6df   :  { %v1820_v14 = vmul.f32 1.0614054, %v3344_v60 }
 0x6e0   :  { %v1849_v23 = vmul.f32 %v3323_v0, %v1841_v59  ;;  %v1842_v47 = vadd.f32 1.4214138, %v1834_v1  ;;  %v1835_v46 = vmul.f32 %v3335_v42, %v1827_v38  ;;  %v3357_v28 = vpop.eup %2692  ;;  %2712 = vpow2.f32 %v1917_v20 }
 0x6e1   :  { %v1828_v51 = vadd.f32 -1.4531521, %v1820_v14  ;;  %v1821_v62 = vmul.f32 1.0614054, %v3357_v28  ;;  %v3365_v56 = vpop.eup %2694  ;;  %2714 = vpow2.f32 %v1919_v11 }
 0x6e2   :  { %v1857_v8 = vadd.f32 -0.28449672, %v1849_v23  ;;  %v1850_v55 = vmul.f32 %v3330_v7, %v1842_v47  ;;  %v1843_v12 = vadd.f32 1.4214138, %v1835_v46  ;;  %v2697_v34 = vpop.eup %2696  ;;  %v1822_v53 = vmul.f32 1.0614054, %v3365_v56 }
 0x6e3   :  { %v1836_v17 = vmul.f32 %v3344_v60, %v1828_v51  ;;  %v1829_v30 = vadd.f32 -1.4531521, %v1821_v62  ;;  %v3372_v31 = vpop.eup %2698 }
 0x6e4   :  { %v1865_v16 = vmul.f32 %v3323_v0, %v1857_v8  ;;  %v1858_v19 = vadd.f32 -0.28449672, %v1850_v55  ;;  %v1851_v9 = vmul.f32 %v3335_v42, %v1843_v12  ;;  %v1830_v23 = vadd.f32 -1.4531521, %v1822_v53 }
 0x6e5   :  { %v1844_v24 = vadd.f32 1.4214138, %v1836_v17  ;;  %v1837_v1 = vmul.f32 %v3357_v28, %v1829_v30  ;;  %v1823_v14 = vmul.f32 1.0614054, %v3372_v31 }
 0x6e6   :  { %v1873_v13 = vadd.f32 0.2548296, %v1865_v16  ;;  %v1866_v25 = vmul.f32 %v3330_v7, %v1858_v19  ;;  %v1859_v5 = vadd.f32 -0.28449672, %v1851_v9  ;;  %v1838_v8 = vmul.f32 %v3365_v56, %v1830_v23 }
 0x6e7   :  { %v1852_v36 = vmul.f32 %v3344_v60, %v1844_v24  ;;  %v1845_v46 = vadd.f32 1.4214138, %v1837_v1  ;;  %v1831_v51 = vadd.f32 -1.4531521, %v1823_v14  ;;  %v1746_v23 = vmul.f32 0.5, %v3281_v32 }
 0x6e8   :  { %v1881_v33 = vmul.f32 %v3323_v0, %v1873_v13  ;;  %v1874_v59 = vadd.f32 0.2548296, %v1866_v25  ;;  %v1867_v35 = vmul.f32 %v3335_v42, %v1859_v5  ;;  %v2701_v0 = vpop.eup %2700  ;;  %v1846_v19 = vadd.f32 1.4214138, %v1838_v8 }
 0x6e9   :  { %v1860_v40 = vadd.f32 -0.28449672, %v1852_v36  ;;  %v3378_v22 = vpop.eup %2702  ;;  %v1853_v15 = vmul.f32 %v3357_v28, %v1845_v46  ;;  %v1839_v9 = vmul.f32 %v3372_v31, %v1831_v51 }
 0x6ea   :  { %v1921_v38 = vmul.f32 %v2697_v34, %v1881_v33  ;;  %v1882_v3 = vmul.f32 %v3330_v7, %v1874_v59  ;;  %v1875_v47 = vadd.f32 0.2548296, %v1867_v35  ;;  %v1824_v16 = vmul.f32 1.0614054, %v3378_v22  ;;  %v2705_v17 = vpop.eup %2704 }
 0x6eb   :  { %v1868_v6 = vmul.f32 %v3344_v60, %v1860_v40  ;;  %v1861_v13 = vadd.f32 -0.28449672, %v1853_v15  ;;  %v1847_v5 = vadd.f32 1.4214138, %v1839_v9  ;;  %v2707_v30 = vpop.eup %2706 }
 0x6ec   :  { %v1922_v55 = vmul.f32 %v2701_v0, %v1882_v3  ;;  %v1883_v12 = vmul.f32 %v3335_v42, %v1875_v47  ;;  %v1929_v7 = vsub.f32 1.0, %v1921_v38  ;;  %v1832_v24 = vadd.f32 -1.4531521, %v1824_v16  ;;  %v2709_v35 = vpop.eup %2708 }
 0x6ed   :  { %v1876_v18 = vadd.f32 0.2548296, %v1868_v6  ;;  %v1854_v42 = vmul.f32 %v3365_v56, %v1846_v19  ;;  %v1869_v34 = vmul.f32 %v3357_v28, %v1861_v13  ;;  %v1855_v59 = vmul.f32 %v3372_v31, %v1847_v5  ;;  %v2711_v8 = vpop.eup %2710 }
 0x6ee   :  { %v1930_v62 = vsub.f32 1.0, %v1922_v55  ;;  %v1923_v4 = vmul.f32 %v2705_v17, %v1883_v12  ;;  %v1840_v33 = vmul.f32 %v3378_v22, %v1832_v24  ;;  %v1937_v1 = vmul.f32 %v1929_v7, %v3342_v58  ;;  %v2713_v16 = vpop.eup %2712 }
 0x6ef   :  { %v1884_v25 = vmul.f32 %v3344_v60, %v1876_v18  ;;  %v1862_v26 = vadd.f32 -0.28449672, %v1854_v42  ;;  %v1877_v38 = vadd.f32 0.2548296, %v1869_v34  ;;  %v1863_v3 = vadd.f32 -0.28449672, %v1855_v59 }
 0x6f0   :  { %v1931_v20 = vsub.f32 1.0, %v1923_v4  ;;  %v1938_v36 = vmul.f32 %v1930_v62, %v3351_v2  ;;  %v1848_v40 = vadd.f32 1.4214138, %v1840_v33  ;;  %v1772_v2 = vsel %vm1764_vm8, 1.0, %v2823_v54 }
 0x6f1   :  { %v1924_v53 = vmul.f32 %v2707_v30, %v1884_v25  ;;  %v1870_v0 = vmul.f32 %v3365_v56, %v1862_v26  ;;  %v1885_v46 = vmul.f32 %v3357_v28, %v1877_v38  ;;  %v1871_v11 = vmul.f32 %v3372_v31, %v1863_v3 }
 0x6f2   :  { %v1939_v60 = vmul.f32 %v1931_v20, %v1771_v48  ;;  %v1856_v6 = vmul.f32 %v3378_v22, %v1848_v40  ;;  %v1946_v58 = vadd.f32 1.0, %v1938_v36  ;;  %v1945_v32 = vadd.f32 1.0, %v1937_v1  ;;  %v2715_v20 = vpop.eup %2714 }
 0x6f3   :  { %v1932_v14 = vsub.f32 1.0, %v1924_v53  ;;  %v1878_v51 = vadd.f32 0.2548296, %v1870_v0  ;;  %v1747_v55 = vmul.f32 0.5, %v3287_v43  ;;  %v1748_v12 = vmul.f32 0.5, %v3293_v49 }
 0x6f4   :  { %v1947_v47 = vadd.f32 1.0, %v1939_v60  ;;  %v1864_v15 = vadd.f32 -0.28449672, %v1856_v6  ;;  %v1925_v57 = vmul.f32 %v2709_v35, %v1885_v46  ;;  %v1879_v28 = vadd.f32 0.2548296, %v1871_v11 }
 0x6f5   :  { %v1940_v48 = vmul.f32 %v1932_v14, %v1772_v2  ;;  %v1886_v7 = vmul.f32 %v3365_v56, %v1878_v51  ;;  %v1745_v18 = vmul.f32 0.5, %v3276_v10  ;;  %v1954_v62 = vmul.f32 %v1946_v58, %v1746_v23 }
 0x6f6   :  { %v1955_v19 = vmul.f32 %v1947_v47, %v1747_v55  ;;  %v1872_v9 = vmul.f32 %v3378_v22, %v1864_v15  ;;  %v1887_v43 = vmul.f32 %v3372_v31, %v1879_v28  ;;  %v1933_v56 = vsub.f32 1.0, %v1925_v57 }
 0x6f7   :  { %v1948_v17 = vadd.f32 1.0, %v1940_v48  ;;  %v1926_v13 = vmul.f32 %v2711_v8, %v1886_v7  ;;  %v1953_v49 = vmul.f32 %v1945_v32, %v1745_v18  ;;  %v1773_v34 = vsel %vm1765_vm9, 1.0, %v2823_v54 }
 0x6f8   :  { %v1880_v24 = vadd.f32 0.2548296, %v1872_v9  ;;  %v1927_v42 = vmul.f32 %v2713_v16, %v1887_v43  ;;  %v1774_v31 = vsel %vm1766_vm10, 1.0, %v2823_v54  ;;  %v1941_v53 = vmul.f32 %v1933_v56, %v1773_v34 }
 0x6f9   :  { %v1956_v4 = vmul.f32 %v1948_v17, %v1748_v12  ;;  %v1934_v25 = vsub.f32 1.0, %v1926_v13  ;;  %v1961_v5 = vpack.c.bf16 %v1955_v19, %v1953_v49  ;;  %v1776_v35 = vsel %vm1768_vm12, 1.0, %v2823_v54 }
 0x6fa   :  { %v1888_v30 = vmul.f32 %v3378_v22, %v1880_v24  ;;  %v1935_v33 = vsub.f32 1.0, %v1927_v42  ;;  %v1949_v60 = vadd.f32 1.0, %v1941_v53  ;;  %v1751_v38 = vmul.f32 0.5, %v3311_v27 }
 0x6fb   :  { %v1962_v10 = vpack.c.bf16 %v1956_v4, %v1954_v62  ;;  %v1942_v52 = vmul.f32 %v1934_v25, %v1774_v31  ;;  %v1750_v40 = vmul.f32 0.5, %v3302_v44  ;;  %v1752_v23 = vmul.f32 0.5, %v3317_v41  ;;  %v2287_v44 = vld [vmem:[%s3460_s12] ss:$0 sm:$0xff] }
 0x6fc   :  { %v1928_v36 = vmul.f32 %v2715_v20, %v1888_v30  ;;  %v1943_v26 = vmul.f32 %v1935_v33, %v1775_v29  ;;  %v1957_v2 = vmul.f32 %v1949_v60, %v1749_v61 }
 0x6fd   :  { %2132 = vmatprep.mubr.bf16.mxu1 %v1962_v10  ;;  %v1950_v1 = vadd.f32 1.0, %v1942_v52 }
 0x6fe   :  { %2133 = vmatmul.mubr.bf16.vlgmr.msra.gmra.mxu1 %v1961_v5  ;;  %v1936_v59 = vsub.f32 1.0, %v1928_v36  ;;  %v1951_v22 = vadd.f32 1.0, %v1943_v26 }
 0x6ff   :  { %v1958_v3 = vmul.f32 %v1950_v1, %v1750_v40 }
 0x700   :  { %v1944_v45 = vmul.f32 %v1936_v59, %v1776_v35  ;;  %v1959_v0 = vmul.f32 %v1951_v22, %v1751_v38 }
 0x702   :  { %v1952_v14 = vadd.f32 1.0, %v1944_v45  ;;  %v1963_v6 = vpack.c.bf16 %v1959_v0, %v1957_v2  ;;  %v2304_v45 = vld [vmem:[%s3455_s7] ss:$0 sm:$0xff] }
 0x704   :  { %v1960_v47 = vmul.f32 %v1952_v14, %v1752_v23  ;;  %v2305_v14 = vld [vmem:[%s3456_s8] ss:$0 sm:$0xff] }
 0x706   :  { %v1964_v46 = vpack.c.bf16 %v1960_v47, %v1958_v3 }
 0x708   :  { %2140 = vmatprep.mubr.bf16.mxu1 %v1964_v46 }
 0x709   :  { %2141 = vmatmul.mubr.bf16.gmra.mxu1 %v1963_v6 }
 0x7be   :  { %v2374_v54 = vpop.f32.mrf.mxu1 }
 0x7c0   :  { %v2375_v8 = vpop.f32.mrf.mxu1 }
 0x7c1   :  { %v2376_v51 = vadd.f32 %v2375_v8, %v2374_v54 }
 0x7c2   :  { %v2377_v58 = vpop.f32.mrf.mxu1 }
 0x7c3   :  { %v2135_v32 = vadd.f32 %v2376_v51, %v2287_v44 }
 0x7c4   :  { %v2378_v48 = vpop.f32.mrf.mxu1 }
 0x7c5   :  { %v2379_v27 = vadd.f32 %v2378_v48, %v2377_v58  ;;  %v2149_v57 = vadd.f32 %v2135_v32, %v3256_v21 }
 0x7c7   :  { %v2138_v63 = vadd.f32 %v2379_v27, %v2287_v44 }
 0x7c9   :  { %v2380_v41 = vpop.f32.mrf.mxu1  ;;  %v2150_v15 = vadd.f32 %v2138_v63, %v3258_v50 }
 0x7cb   :  { %v2381_v11 = vpop.f32.mrf.mxu1  ;;  %v2155_v18 = vadd.f32 %v2150_v15, %v2149_v57 }
 0x7cc   :  { %v2382_v55 = vadd.f32 %v2381_v11, %v2380_v41 }
 0x7cd   :  { %v2383_v12 = vpop.f32.mrf.mxu1 }
 0x7ce   :  { %v2143_v16 = vadd.f32 %v2382_v55, %v2287_v44 }
 0x7cf   :  { %v2384_v17 = vpop.f32.mrf.mxu1 }
 0x7d0   :  { %v2151_v7 = vadd.f32 %v2143_v16, %v3263_v37  ;;  %v2385_v28 = vadd.f32 %v2384_v17, %v2383_v12 }
 0x7d2   :  { %v2146_v19 = vadd.f32 %v2385_v28, %v2287_v44  ;;  %v2156_v9 = vadd.f32 %v2155_v18, %v2151_v7 }
 0x7d4   :  { %v2152_v62 = vadd.f32 %v2146_v19, %v3265_v39 }
 0x7d6   :  { %v2157_v4 = vadd.f32 %v2156_v9, %v2152_v62 }
 0x7d8   :  { %v2158_v13 = vrot.slane %v2157_v4, 4 }
 0x7da   :  { %v2159_v43 = vadd.f32 %v2158_v13, %v2157_v4 }
 0x7dc   :  { %v2160_v49 = vrot.slane %v2159_v43, 2 }
 0x7de   :  { %v2161_v24 = vadd.f32 %v2160_v49, %v2159_v43 }
 0x7e0   :  { %v2162_v56 = vrot.slane %v2161_v24, 1 }
 0x7e2   :  { %v2163_v25 = vadd.f32 %v2162_v56, %v2161_v24 }
 0x7e4   :  { %v2164_v50 = vmul.f32 0.03125, %v2163_v25 }
 0x7e6   :  { %v2165_v42 = vsub.f32 %v2149_v57, %v2164_v50  ;;  %v2166_v10 = vsub.f32 %v2150_v15, %v2164_v50  ;;  %v2167_v5 = vsub.f32 %v2151_v7, %v2164_v50  ;;  %v2168_v21 = vsub.f32 %v2152_v62, %v2164_v50 }
 0x7e8   :  { %v2169_v30 = vmul.f32 %v2165_v42, %v2165_v42  ;;  %v2170_v37 = vmul.f32 %v2166_v10, %v2166_v10  ;;  %v2171_v20 = vmul.f32 %v2167_v5, %v2167_v5  ;;  %v2172_v31 = vmul.f32 %v2168_v21, %v2168_v21 }
 0x7ea   :  { %v2173_v34 = vadd.f32 %v2170_v37, %v2169_v30 }
 0x7ec   :  { %v2174_v33 = vadd.f32 %v2173_v34, %v2171_v20 }
 0x7ee   :  { %v2175_v52 = vadd.f32 %v2174_v33, %v2172_v31 }
 0x7f0   :  { %v2176_v39 = vrot.slane %v2175_v52, 4 }
 0x7f2   :  { %v2177_v29 = vadd.f32 %v2176_v39, %v2175_v52 }
 0x7f4   :  { %v2178_v36 = vrot.slane %v2177_v29, 2 }
 0x7f6   :  { %v2179_v53 = vadd.f32 %v2178_v36, %v2177_v29 }
 0x7f8   :  { %v2180_v26 = vrot.slane %v2179_v53, 1 }
 0x7fa   :  { %v2181_v59 = vadd.f32 %v2180_v26, %v2179_v53 }
 0x7fc   :  { %v2182_v22 = vmul.f32 0.03125, %v2181_v59 }
 0x7fe   :  { %v2183_v35 = vadd.f32 1e-05, %v2182_v22 }
 0x800   :  { %2716 = vrsqrt.f32 %v2183_v35 }
 0x80d   :  { %v2717_v1 = vpop.eup %2716 }
 0x80e   :  { %v2185_v60 = vmul.f32 %v2717_v1, %v2165_v42  ;;  %v2186_v38 = vmul.f32 %v2717_v1, %v2166_v10  ;;  %v2187_v40 = vmul.f32 %v2717_v1, %v2167_v5  ;;  %v2188_v23 = vmul.f32 %v2717_v1, %v2168_v21 }
 0x810   :  { %v2195_v61 = vmul.f32 %v2304_v45, %v2185_v60  ;;  %v2196_v0 = vmul.f32 %v2304_v45, %v2186_v38  ;;  %v2197_v3 = vmul.f32 %v2304_v45, %v2187_v40  ;;  %v2198_v47 = vmul.f32 %v2304_v45, %v2188_v23 }
 0x812   :  { %v2205_v2 = vadd.f32 %v2305_v14, %v2195_v61  ;;  %v2206_v46 = vadd.f32 %v2305_v14, %v2196_v0  ;;  %v2207_v6 = vadd.f32 %v2305_v14, %v2197_v3  ;;  %v2208_v54 = vadd.f32 %v2305_v14, %v2198_v47 }
 0x814   :  { %2209 = vst [vmem:[%s3461_s13] sm:$0xff] %v2205_v2  ;;  %2210 = vst [vmem:[%s3461_s13 + $0x8] sm:$0xff] %v2206_v46 }
 0x815   :  { %2211 = vst [vmem:[%s3461_s13 + $0x10] sm:$0xff] %v2207_v6  ;;  %2212 = vst [vmem:[%s3461_s13 + $0x18] sm:$0xff] %v2208_v54 }
 0x816   :  { %2217 = vsyncpa [#allocation3], 1 }
 0x817   :  { %2218 = vsyncpa [#allocation5], 1 }
 0x818   :  { %2219 = vsyncpa [#allocation8], 1 }

</bundles_post_ra>
